<compile_context>
chip_gen: v7x
topology: tpu7x:2x2x1
jax: 0.10.0
libtpu: 0.0.40
codegen_flags: <defaults>
</compile_context>

<pallas_src>
import math

import jax
import jax.numpy as jnp
from jax.experimental import pallas as pl
from jax.experimental.pallas import tpu as pltpu

# ----- static config (small, consistent with ModelBase.forward) -----
B = 2               # batch
C = 3               # num_channels
S = 16              # image_size (H = W = S)
HW = S * S          # 256 pixels -> lane axis
K = 4               # num_objects
KP1 = K + 1         # object slots + background
SLOT_PAD = 8        # KP1 padded to a full sublane tile; rows 5..7 are padding
U = 32              # updater_size
D = 32              # state_size
NUM_STEPS = 2
BACK_LR_INIT = 0.1
SIGMA = 0.2         # std of the Gaussian stand-in for compute_log_prob_cond
DEC_W = HW + 128    # lane-padded width of the fused decoder weight (logits|mu|pad)
NEG_BIG = -1e30     # effectively -inf for the padding slot rows

f32 = jnp.float32
_INV_VAR = 1.0 / (SIGMA * SIGMA)
_LOG_CONST = -0.5 * math.log(2.0 * math.pi * SIGMA * SIGMA)


# ---------------------------- fused kernel ----------------------------

def _fused_forward_kernel(img_ref, imgT_ref, mu_back0_ref,
                          We_ref, be_ref, Wdec_ref, bdec_ref,
                          Wihp_ref, Wihm_ref, Whh_ref, brnn_ref, back_lr_ref,
                          gamma_out, logp_out, pi_out, mu_out):
    # one batch element per grid program
    img = img_ref[0]            # (C, HW)
    imgT = imgT_ref[0]          # (HW, C)
    mu_back0 = mu_back0_ref[0]  # (1, C)   outputs_mu_prior for this batch
    We = We_ref[...]            # (HW, U)  encoder_pi stand-in
    be = be_ref[...]            # (1, U)
    Wdec = Wdec_ref[...]        # (D, DEC_W)  [:, :HW]=decoder_pi, [:, HW:HW+C]=decoder_mu
    bdec = bdec_ref[...]        # (1, DEC_W)
    Wihp = Wihp_ref[...]        # (U, D)   UpdaterRNN Wih (encoder-feature rows)
    Wihm = Wihm_ref[...]        # (C, D)   UpdaterRNN Wih (delta_mu rows)
    Whh = Whh_ref[...]          # (D, D)
    brnn = brnn_ref[...]        # (1, D)
    back_lr = back_lr_ref[0, 0]  # scalar (SMEM)

    # ----- step-invariant constants (hoisted out of the step loop) -----
    row = jax.lax.broadcasted_iota(jnp.int32, (SLOT_PAD, 1), 0)
    obj_row = row < K                                   # rows holding object slots
    objmask = obj_row.astype(f32)                       # (8, 1)
    padneg = jnp.where(row < KP1, 0.0, NEG_BIG)         # (8, 1) kills padding rows
    ri = jax.lax.broadcasted_iota(jnp.int32, (SLOT_PAD, SLOT_PAD), 0)
    ci = jax.lax.broadcasted_iota(jnp.int32, (SLOT_PAD, SLOT_PAD), 1)
    Lc = (ci < ri).astype(f32)                          # strict lower-triangular (8,8)
    img_sq = jnp.sum(img * img, axis=0, keepdims=True)  # (1, HW)
    lpc_base = (C * _LOG_CONST - 0.5 * _INV_VAR * img_sq) \
        + jnp.zeros((SLOT_PAD, HW), f32)                # pre-broadcast once
    mu_back_init = mu_back0 + jnp.zeros((SLOT_PAD, C), f32)
    blr = back_lr * (1.0 / HW)

    def excl_cumsum(x):
        # exclusive prefix-sum over the slot (row) axis, whole-array matmul
        return jnp.dot(Lc, x, preferred_element_type=f32)

    def decode(features):
        # decoder_pi + decoder_mu fused into one lane-dense MXU pass
        z = jnp.dot(features, Wdec, preferred_element_type=f32) + bdec   # (8, DEC_W)
        logits = z[:, :HW]                                               # (8, HW)
        mu_obj = z[:, HW:HW + C]                                         # (8, C)
        # stable log-sigmoid; pi derived from it (one exp chain on the EUP)
        log_pi = jnp.minimum(logits, 0.0) - jnp.log1p(jnp.exp(-jnp.abs(logits)))
        pi = jnp.exp(log_pi)
        return pi, log_pi, logits, mu_obj

    def log_prob_cond(mu):
        # TODO(synk): compute_log_prob_cond is abstract in ModelBase; fixed-sigma
        # Gaussian likelihood summed over channels is used as a stand-in.
        cross = jnp.dot(mu, img, preferred_element_type=f32)             # (8, HW)
        mu_sq = jnp.sum(mu * mu, axis=1, keepdims=True)                  # (8, 1)
        return lpc_base + _INV_VAR * cross - 0.5 * _INV_VAR * mu_sq

    def prior_and_gamma(log_pi, logits, lpc):
        q = log_pi - logits                               # log(1 - pi)
        prior = objmask * log_pi + excl_cumsum(q)         # compute_log_prob_prior
        log_prob = prior + lpc + padneg                   # padding rows ~ -inf
        m = jnp.max(log_prob, axis=0, keepdims=True)      # slot-axis reductions are
        e = jnp.exp(log_prob - m)                         # whole-array axis-0 ops
        denom = jnp.sum(e, axis=0, keepdims=True)
        gamma = e / denom                                 # exact normalisation
        return gamma, log_prob

    def encoder_pi(gamma, pi):
        # x = gamma - (1 - exclusive-slot-cumsum(gamma)) * pi, whole-array form
        x = gamma - (1.0 - excl_cumsum(gamma)) * pi
        # TODO(synk): encoder_pi is an external conv Encoder; linear+ReLU stand-in.
        return jnp.maximum(jnp.dot(x, We, preferred_element_type=f32) + be, 0.0)

    def delta_mu_raw(gamma, mu):
        # HW * mean_p[gamma * (img - mu)]  ==  gamma @ img^T - mu * sum_p gamma
        cross = jnp.dot(gamma, imgT, preferred_element_type=f32)         # (8, C)
        gsum = jnp.sum(gamma, axis=1, keepdims=True)                     # (8, 1)
        return cross - mu * gsum

    def rnn_cell(x_pi, dm, h):
        # TODO(synk): UpdaterRNN is an external module; vanilla tanh-RNN stand-in.
        z = (jnp.dot(x_pi, Wihp, preferred_element_type=f32)
             + jnp.dot(dm, Wihm, preferred_element_type=f32)
             + jnp.dot(h, Whh, preferred_element_type=f32) + brnn)
        return jnp.tanh(z)

    # ----- forward (mirrors ModelBase.forward) -----
    # TODO(synk): UpdaterRNN.init_states is an external module; zero-init stand-in.
    features = jnp.zeros((SLOT_PAD, D), f32)
    states = jnp.zeros((SLOT_PAD, D), f32)

    pi, log_pi, logits, mu_obj = decode(features)
    # TODO(synk): compute_mu is abstract; identity stand-in (mu == outputs_mu).
    mu = jnp.where(obj_row, mu_obj, mu_back_init)         # (8, C); row K = background
    lpc = log_prob_cond(mu)
    gamma, log_prob = prior_and_gamma(log_pi, logits, lpc)

    for t in range(NUM_STEPS):                             # unrolled (NUM_STEPS=2)
        # TODO(synk): add_noise is abstract; identity stand-in (noisy == images).
        x_enc = encoder_pi(gamma, pi)                      # (8, U)
        dm = delta_mu_raw(gamma, mu)                       # (8, C) == HW * delta_mu
        features = rnn_cell(x_enc, dm, states)             # RNN sees un-normalised dm
        states = features
        pi, log_pi, logits, mu_obj = decode(features)
        # background row: outputs_mu_back += back_lr * delta_mu_back
        mu = jnp.where(obj_row, mu_obj, mu + blr * dm)
        lpc = log_prob_cond(mu)
        gamma, log_prob = prior_and_gamma(log_pi, logits, lpc)
        gamma_out[0, t] = gamma                            # lane-dense (8, 256) stores
        logp_out[0, t] = log_prob
        pi_out[0, t] = pi
        mu_out[0, t] = mu


# ---------------------------- parameters ----------------------------

def init_params(key):
    ks = jax.random.split(key, 6)
    p = {}
    p["We"] = 0.05 * jax.random.normal(ks[0], (HW, U), f32)      # encoder_pi stand-in
    p["be"] = jnp.zeros((1, U), f32)
    # decoder_pi (linear stand-in) and decoder_mu fused into one lane-padded weight:
    # columns [0, HW) -> pi logits, [HW, HW+C) -> mu, rest zero padding.
    Wd = 0.05 * jax.random.normal(ks[1], (D, HW), f32)
    Wm = 0.05 * jax.random.normal(ks[2], (D, C), f32)
    p["Wdec"] = jnp.zeros((D, DEC_W), f32).at[:, :HW].set(Wd).at[:, HW:HW + C].set(Wm)
    p["bdec"] = jnp.zeros((1, DEC_W), f32)
    # UpdaterRNN input weight, split into its [encoder features | delta_mu] row blocks.
    p["Wih_pi"] = 0.05 * jax.random.normal(ks[3], (U, D), f32)
    p["Wih_mu"] = 0.05 * jax.random.normal(ks[4], (C, D), f32)
    p["Whh"] = 0.05 * jax.random.normal(ks[5], (D, D), f32)
    p["brnn"] = jnp.zeros((1, D), f32)
    p["back_lr"] = jnp.full((1, 1), BACK_LR_INIT, f32)
    # TODO(synk): outputs_mu_prior is defined only in subclasses; zero init here.
    p["outputs_mu_prior"] = jnp.zeros((1, C), f32)
    return p


# ---------------------------- forward wrapper ----------------------------

def _rep_spec(shape):
    """Whole-array block, replicated (same block) for every batch program."""
    zeros = (0,) * len(shape)
    return pl.BlockSpec(shape, lambda b, _z=zeros: _z)


@jax.jit
def model_forward(params, images):
    img3 = images.astype(f32).reshape(B, C, HW)              # (B, C, HW)
    imgT3 = jnp.transpose(img3, (0, 2, 1))                   # (B, HW, C)
    mu_back0 = jnp.broadcast_to(params["outputs_mu_prior"].reshape(1, 1, C),
                                (B, 1, C))

    inputs = (img3, imgT3, mu_back0,
              params["We"], params["be"], params["Wdec"], params["bdec"],
              params["Wih_pi"], params["Wih_mu"], params["Whh"], params["brnn"],
              params["back_lr"])

    in_specs = [
        pl.BlockSpec((1, C, HW), lambda b: (b, 0, 0)),        # images
        pl.BlockSpec((1, HW, C), lambda b: (b, 0, 0)),        # images^T
        pl.BlockSpec((1, 1, C), lambda b: (b, 0, 0)),         # mu_back init
        _rep_spec((HW, U)), _rep_spec((1, U)),                # We, be
        _rep_spec((D, DEC_W)), _rep_spec((1, DEC_W)),         # Wdec, bdec
        _rep_spec((U, D)), _rep_spec((C, D)),                 # Wih_pi, Wih_mu
        _rep_spec((D, D)), _rep_spec((1, D)),                 # Whh, brnn
        pl.BlockSpec((1, 1), lambda b: (0, 0),
                     memory_space=pltpu.MemorySpace.SMEM),    # back_lr scalar
    ]
    out_shape = (
        jax.ShapeDtypeStruct((B, NUM_STEPS, SLOT_PAD, HW), f32),   # gamma
        jax.ShapeDtypeStruct((B, NUM_STEPS, SLOT_PAD, HW), f32),   # log_prob
        jax.ShapeDtypeStruct((B, NUM_STEPS, SLOT_PAD, HW), f32),   # pi
        jax.ShapeDtypeStruct((B, NUM_STEPS, SLOT_PAD, C), f32),    # mu / outputs_mu
    )
    out_specs = (
        pl.BlockSpec((1, NUM_STEPS, SLOT_PAD, HW), lambda b: (b, 0, 0, 0)),
        pl.BlockSpec((1, NUM_STEPS, SLOT_PAD, HW), lambda b: (b, 0, 0, 0)),
        pl.BlockSpec((1, NUM_STEPS, SLOT_PAD, HW), lambda b: (b, 0, 0, 0)),
        pl.BlockSpec((1, NUM_STEPS, SLOT_PAD, C), lambda b: (b, 0, 0, 0)),
    )

    gamma_s, logp_s, pi_s, mu_s = pl.pallas_call(
        _fused_forward_kernel,
        grid=(B,),
        in_specs=in_specs,
        out_specs=out_specs,
        out_shape=out_shape,
        compiler_params=pltpu.CompilerParams(dimension_semantics=("parallel",)),
    )(*inputs)

    results = []
    for t in range(NUM_STEPS):
        gamma_t = jnp.transpose(gamma_s[:, t, :KP1, :], (1, 0, 2)).reshape(KP1, B, 1, S, S)
        logp_t = jnp.transpose(logp_s[:, t, :KP1, :], (1, 0, 2)).reshape(KP1, B, 1, S, S)
        pi_t = jnp.transpose(pi_s[:, t, :K, :], (1, 0, 2)).reshape(K, B, 1, S, S)
        mu_t = jnp.transpose(mu_s[:, t, :KP1, :], (1, 0, 2)).reshape(KP1, B, C, 1, 1)
        results.append({
            "gamma": gamma_t,
            "log_prob": logp_t,
            "pi": pi_t,
            "mu": mu_t,          # TODO(synk): compute_mu is an identity stand-in,
            "outputs_mu": mu_t,  # so mu == outputs_mu here.
        })
    return results


# ---------------------------- pure-JAX reference ----------------------------

def _ref_forward(params, images):
    """Plain-JAX forward with the same stand-in semantics (for validation)."""
    img = images.astype(f32).reshape(B, C, HW)
    We, be = params["We"], params["be"]
    Wd, Wm = params["Wdec"][:, :HW], params["Wdec"][:, HW:HW + C]
    bd, bm = params["bdec"][:, :HW], params["bdec"][:, HW:HW + C]
    Wihp, Wihm = params["Wih_pi"], params["Wih_mu"]
    Whh, brnn = params["Whh"], params["brnn"]
    back_lr = params["back_lr"][0, 0]
    prior_mu = params["outputs_mu_prior"]                 # (1, C)

    def decode(f):
        logits = f @ Wd + bd
        mu_obj = f @ Wm + bm
        log_pi = jnp.minimum(logits, 0.0) - jnp.log1p(jnp.exp(-jnp.abs(logits)))
        return jnp.exp(log_pi), log_pi, logits, mu_obj

    def excl_cumsum(x):
        return jnp.concatenate(
            [jnp.zeros((1,) + x.shape[1:], f32), jnp.cumsum(x, axis=0)], axis=0)

    per_step = [dict(gamma=[], log_prob=[], pi=[], mu=[]) for _ in range(NUM_STEPS)]
    for b in range(B):
        ib = img[b]                                        # (C, HW)
        img_sq = jnp.sum(ib * ib, axis=0, keepdims=True)

        def log_prob_cond(mu):
            sq = img_sq - 2.0 * (mu @ ib) + jnp.sum(mu * mu, axis=1, keepdims=True)
            return C * _LOG_CONST - 0.5 * _INV_VAR * sq

        def prior_gamma(log_pi, logits, lpc):
            q = log_pi - logits
            prior = jnp.concatenate([log_pi, jnp.zeros((1, HW), f32)], 0) + excl_cumsum(q)
            log_prob = prior + lpc
            return jax.nn.softmax(log_prob, axis=0), log_prob

        features = jnp.zeros((K, D), f32)
        states = jnp.zeros((K, D), f32)
        mu_back = prior_mu
        pi, log_pi, logits, mu_obj = decode(features)
        mu = jnp.concatenate([mu_obj, mu_back], axis=0)
        gamma, log_prob = prior_gamma(log_pi, logits, log_prob_cond(mu))

        for t in range(NUM_STEPS):
            x = gamma[:K] - (1.0 - excl_cumsum(gamma[:K - 1])) * pi
            x_enc = jnp.maximum(x @ We + be, 0.0)
            dm = gamma @ ib.T - mu * jnp.sum(gamma, axis=1, keepdims=True)
            features = jnp.tanh(x_enc @ Wihp + dm[:K] @ Wihm + states @ Whh + brnn)
            states = features
            pi, log_pi, logits, mu_obj = decode(features)
            mu_back = mu_back + back_lr * (1.0 / HW) * dm[K:]
            mu = jnp.concatenate([mu_obj, mu_back], axis=0)
            gamma, log_prob = prior_gamma(log_pi, logits, log_prob_cond(mu))
            per_step[t]["gamma"].append(gamma)
            per_step[t]["log_prob"].append(log_prob)
            per_step[t]["pi"].append(pi)
            per_step[t]["mu"].append(mu)

    results = []
    for t in range(NUM_STEPS):
        results.append({
            "gamma": jnp.stack(per_step[t]["gamma"], 1).reshape(KP1, B, 1, S, S),
            "log_prob": jnp.stack(per_step[t]["log_prob"], 1).reshape(KP1, B, 1, S, S),
            "pi": jnp.stack(per_step[t]["pi"], 1).reshape(K, B, 1, S, S),
            "mu": jnp.stack(per_step[t]["mu"], 1).reshape(KP1, B, C, 1, 1),
        })
    return results


if __name__ == "__main__":
    key = jax.random.PRNGKey(0)
    pkey, xkey = jax.random.split(key)
    params = init_params(pkey)
    images = jax.random.uniform(xkey, (B, C, S, S), dtype=f32)

    results = model_forward(params, images)
    jax.block_until_ready(results)

    g = results[-1]["gamma"]
    assert g.shape == (KP1, B, 1, S, S)
    assert results[-1]["pi"].shape == (K, B, 1, S, S)
    assert results[-1]["mu"].shape == (KP1, B, C, 1, 1)
    # exact softmax normalisation -> slot responsibilities sum to 1
    assert bool(jnp.allclose(jnp.sum(g, axis=0), 1.0, atol=1e-4))

    # compare against the pure-JAX reference of the same stand-in forward
    ref = _ref_forward(params, images)
    for t in range(NUM_STEPS):
        for name in ("gamma", "pi", "mu", "log_prob"):
            a, r = results[t][name], ref[t][name]
            assert bool(jnp.allclose(a, r, atol=5e-3, rtol=5e-3)), (t, name)

    print("KERNEL_OK")
</pallas_src>

<mosaic_0001>
module attributes {stable_mosaic.version = 11 : i64} {
  func.func @_fused_forward_kernel(%arg0: i32, %arg1: memref<1x3x256xf32, #tpu.memory_space<vmem>>, %arg2: memref<1x256x3xf32, #tpu.memory_space<vmem>>, %arg3: memref<1x1x3xf32, #tpu.memory_space<vmem>>, %arg4: memref<256x32xf32, #tpu.memory_space<vmem>>, %arg5: memref<1x32xf32, #tpu.memory_space<vmem>>, %arg6: memref<32x384xf32, #tpu.memory_space<vmem>>, %arg7: memref<1x384xf32, #tpu.memory_space<vmem>>, %arg8: memref<32x32xf32, #tpu.memory_space<vmem>>, %arg9: memref<3x32xf32, #tpu.memory_space<vmem>>, %arg10: memref<32x32xf32, #tpu.memory_space<vmem>>, %arg11: memref<1x32xf32, #tpu.memory_space<vmem>>, %arg12: memref<1x1xf32, #tpu.memory_space<smem>>, %arg13: memref<1x2x8x256xf32, #tpu.memory_space<vmem>>, %arg14: memref<1x2x8x256xf32, #tpu.memory_space<vmem>>, %arg15: memref<1x2x8x256xf32, #tpu.memory_space<vmem>>, %arg16: memref<1x2x8x3xf32, #tpu.memory_space<vmem>>) attributes {dimension_semantics = [#tpu.dimension_semantics<parallel>], iteration_bounds = array<i64: 2>, scalar_prefetch = 0 : i64, scratch_operands = 0 : i64, tpu.core_type = #tpu.core_type<tc>, window_params = [{transform_indices = @transform_0, window_bounds = array<i64: 1, 3, 256>}, {transform_indices = @transform_1, window_bounds = array<i64: 1, 256, 3>}, {transform_indices = @transform_2, window_bounds = array<i64: 1, 1, 3>}, {pipeline_mode = #tpu.pipeline_mode<synchronous>, transform_indices = @transform_3, window_bounds = array<i64: 256, 32>}, {pipeline_mode = #tpu.pipeline_mode<synchronous>, transform_indices = @transform_4, window_bounds = array<i64: 1, 32>}, {pipeline_mode = #tpu.pipeline_mode<synchronous>, transform_indices = @transform_5, window_bounds = array<i64: 32, 384>}, {pipeline_mode = #tpu.pipeline_mode<synchronous>, transform_indices = @transform_6, window_bounds = array<i64: 1, 384>}, {pipeline_mode = #tpu.pipeline_mode<synchronous>, transform_indices = @transform_7, window_bounds = array<i64: 32, 32>}, {pipeline_mode = #tpu.pipeline_mode<synchronous>, transform_indices = @transform_8, window_bounds = array<i64: 3, 32>}, {pipeline_mode = #tpu.pipeline_mode<synchronous>, transform_indices = @transform_9, window_bounds = array<i64: 32, 32>}, {pipeline_mode = #tpu.pipeline_mode<synchronous>, transform_indices = @transform_10, window_bounds = array<i64: 1, 32>}, {transform_indices = @transform_11, window_bounds = array<i64: 1, 1>}, {transform_indices = @transform_12, window_bounds = array<i64: 1, 2, 8, 256>}, {transform_indices = @transform_13, window_bounds = array<i64: 1, 2, 8, 256>}, {transform_indices = @transform_14, window_bounds = array<i64: 1, 2, 8, 256>}, {transform_indices = @transform_15, window_bounds = array<i64: 1, 2, 8, 3>}]} {
    %c0 = arith.constant 0 : index
    %c0_0 = arith.constant 0 : index
    %c0_1 = arith.constant 0 : index
    %0 = vector.load %arg1[%c0, %c0_0, %c0_1] : memref<1x3x256xf32, #tpu.memory_space<vmem>>, vector<1x3x256xf32>
    %1 = vector.shape_cast %0 : vector<1x3x256xf32> to vector<3x256xf32>
    %c0_2 = arith.constant 0 : index
    %c0_3 = arith.constant 0 : index
    %c0_4 = arith.constant 0 : index
    %2 = vector.load %arg2[%c0_2, %c0_3, %c0_4] : memref<1x256x3xf32, #tpu.memory_space<vmem>>, vector<1x256x3xf32>
    %3 = vector.shape_cast %2 : vector<1x256x3xf32> to vector<256x3xf32>
    %c0_5 = arith.constant 0 : index
    %c0_6 = arith.constant 0 : index
    %c0_7 = arith.constant 0 : index
    %4 = vector.load %arg3[%c0_5, %c0_6, %c0_7] : memref<1x1x3xf32, #tpu.memory_space<vmem>>, vector<1x1x3xf32>
    %5 = vector.shape_cast %4 : vector<1x1x3xf32> to vector<1x3xf32>
    %c0_8 = arith.constant 0 : index
    %c0_9 = arith.constant 0 : index
    %6 = vector.load %arg4[%c0_8, %c0_9] : memref<256x32xf32, #tpu.memory_space<vmem>>, vector<256x32xf32>
    %c0_10 = arith.constant 0 : index
    %c0_11 = arith.constant 0 : index
    %7 = vector.load %arg5[%c0_10, %c0_11] : memref<1x32xf32, #tpu.memory_space<vmem>>, vector<1x32xf32>
    %c0_12 = arith.constant 0 : index
    %c0_13 = arith.constant 0 : index
    %8 = vector.load %arg6[%c0_12, %c0_13] : memref<32x384xf32, #tpu.memory_space<vmem>>, vector<32x384xf32>
    %c0_14 = arith.constant 0 : index
    %c0_15 = arith.constant 0 : index
    %9 = vector.load %arg7[%c0_14, %c0_15] : memref<1x384xf32, #tpu.memory_space<vmem>>, vector<1x384xf32>
    %c0_16 = arith.constant 0 : index
    %c0_17 = arith.constant 0 : index
    %10 = vector.load %arg8[%c0_16, %c0_17] : memref<32x32xf32, #tpu.memory_space<vmem>>, vector<32x32xf32>
    %c0_18 = arith.constant 0 : index
    %c0_19 = arith.constant 0 : index
    %11 = vector.load %arg9[%c0_18, %c0_19] : memref<3x32xf32, #tpu.memory_space<vmem>>, vector<3x32xf32>
    %c0_20 = arith.constant 0 : index
    %c0_21 = arith.constant 0 : index
    %12 = vector.load %arg10[%c0_20, %c0_21] : memref<32x32xf32, #tpu.memory_space<vmem>>, vector<32x32xf32>
    %c0_22 = arith.constant 0 : index
    %c0_23 = arith.constant 0 : index
    %13 = vector.load %arg11[%c0_22, %c0_23] : memref<1x32xf32, #tpu.memory_space<vmem>>, vector<1x32xf32>
    %c0_24 = arith.constant 0 : index
    %c0_25 = arith.constant 0 : index
    %14 = memref.load %arg12[%c0_24, %c0_25] : memref<1x1xf32, #tpu.memory_space<smem>>
    %15 = tpu.iota {dimensions = array<i32: 0>} : vector<8x1xi32>
    %c4_i32 = arith.constant 4 : i32
    %16 = vector.broadcast %c4_i32 : i32 to vector<8x1xi32>
    %17 = arith.cmpi slt, %15, %16 : vector<8x1xi32>
    %18 = arith.extui %17 : vector<8x1xi1> to vector<8x1xi32>
    %19 = arith.sitofp %18 : vector<8x1xi32> to vector<8x1xf32>
    %c5_i32 = arith.constant 5 : i32
    %20 = vector.broadcast %c5_i32 : i32 to vector<8x1xi32>
    %21 = arith.cmpi slt, %15, %20 : vector<8x1xi32>
    %cst = arith.constant 0.000000e+00 : f32
    %cst_26 = arith.constant -1.000000e+30 : f32
    %22 = vector.broadcast %cst : f32 to vector<8x1xf32>
    %23 = vector.broadcast %cst_26 : f32 to vector<8x1xf32>
    %24 = arith.select %21, %22, %23 : vector<8x1xi1>, vector<8x1xf32>
    %25 = tpu.iota {dimensions = array<i32: 0>} : vector<8x8xi32>
    %26 = tpu.iota {dimensions = array<i32: 1>} : vector<8x8xi32>
    %27 = arith.cmpi slt, %26, %25 : vector<8x8xi32>
    %28 = arith.extui %27 : vector<8x8xi1> to vector<8x8xi32>
    %29 = arith.sitofp %28 : vector<8x8xi32> to vector<8x8xf32>
    %30 = arith.mulf %1, %1 : vector<3x256xf32>
    %cst_27 = arith.constant dense<0.000000e+00> : vector<256xf32>
    %31 = vector.multi_reduction <add>, %30, %cst_27 [0] : vector<3x256xf32> to vector<256xf32>
    %32 = vector.shape_cast %31 : vector<256xf32> to vector<1x256xf32>
    %cst_28 = arith.constant 1.250000e+01 : f32
    %33 = vector.broadcast %cst_28 : f32 to vector<1x256xf32>
    %34 = arith.mulf %33, %32 : vector<1x256xf32>
    %cst_29 = arith.constant 2.07149816 : f32
    %35 = vector.broadcast %cst_29 : f32 to vector<1x256xf32>
    %36 = arith.subf %35, %34 : vector<1x256xf32>
    %cst_30 = arith.constant 0.000000e+00 : f32
    %37 = vector.broadcast %cst_30 : f32 to vector<8x256xf32>
    %38 = vector.broadcast %36 : vector<1x256xf32> to vector<8x256xf32>
    %39 = arith.addf %38, %37 : vector<8x256xf32>
    %cst_31 = arith.constant 0.000000e+00 : f32
    %40 = vector.broadcast %cst_31 : f32 to vector<8x3xf32>
    %41 = vector.broadcast %5 : vector<1x3xf32> to vector<8x3xf32>
    %42 = arith.addf %41, %40 : vector<8x3xf32>
    %cst_32 = arith.constant 3.906250e-03 : f32
    %43 = arith.mulf %14, %cst_32 : f32
    %cst_33 = arith.constant 0.000000e+00 : f32
    %44 = vector.broadcast %cst_33 : f32 to vector<8x32xf32>
    %cst_34 = arith.constant 0.000000e+00 : f32
    %45 = vector.broadcast %cst_34 : f32 to vector<8x32xf32>
    %cst_35 = arith.constant dense<0.000000e+00> : vector<8x384xf32>
    %46 = tpu.matmul %44, %8, %cst_35 {dimension_numbers = #tpu.dot_dimension_numbers<[1], [0], [0], [1], [0, 0, 1, 1], [], []>} : vector<8x32xf32>, vector<32x384xf32>, vector<8x384xf32> -> vector<8x384xf32>
    %47 = vector.broadcast %9 : vector<1x384xf32> to vector<8x384xf32>
    %48 = arith.addf %46, %47 : vector<8x384xf32>
    %49 = vector.extract_strided_slice %48 {offsets = [0, 0], sizes = [8, 256], strides = [1, 1]} : vector<8x384xf32> to vector<8x256xf32>
    %50 = vector.extract_strided_slice %48 {offsets = [0, 256], sizes = [8, 3], strides = [1, 1]} : vector<8x384xf32> to vector<8x3xf32>
    %cst_36 = arith.constant 0.000000e+00 : f32
    %51 = vector.broadcast %cst_36 : f32 to vector<8x256xf32>
    %52 = arith.minimumf %49, %51 : vector<8x256xf32>
    %53 = math.absf %49 : vector<8x256xf32>
    %cst_37 = arith.constant 0.000000e+00 : f32
    %54 = vector.broadcast %cst_37 : f32 to vector<8x256xf32>
    %55 = arith.subf %54, %53 : vector<8x256xf32>
    %56 = math.exp %55 : vector<8x256xf32>
    %57 = math.log1p %56 : vector<8x256xf32>
    %58 = arith.subf %52, %57 : vector<8x256xf32>
    %59 = math.exp %58 : vector<8x256xf32>
    %60 = vector.shape_cast %17 : vector<8x1xi1> to vector<8x1xi1>
    %61 = vector.broadcast %60 : vector<8x1xi1> to vector<8x3xi1>
    %62 = arith.select %61, %50, %42 : vector<8x3xi1>, vector<8x3xf32>
    %cst_38 = arith.constant dense<0.000000e+00> : vector<8x256xf32>
    %63 = tpu.matmul %62, %1, %cst_38 {dimension_numbers = #tpu.dot_dimension_numbers<[1], [0], [0], [1], [0, 0, 1, 1], [], []>} : vector<8x3xf32>, vector<3x256xf32>, vector<8x256xf32> -> vector<8x256xf32>
    %64 = arith.mulf %62, %62 : vector<8x3xf32>
    %cst_39 = arith.constant dense<0.000000e+00> : vector<8xf32>
    %65 = vector.multi_reduction <add>, %64, %cst_39 [1] : vector<8x3xf32> to vector<8xf32>
    %66 = vector.shape_cast %65 : vector<8xf32> to vector<8x1xf32>
    %cst_40 = arith.constant 2.500000e+01 : f32
    %67 = vector.broadcast %cst_40 : f32 to vector<8x256xf32>
    %68 = arith.mulf %67, %63 : vector<8x256xf32>
    %69 = arith.addf %39, %68 : vector<8x256xf32>
    %cst_41 = arith.constant 1.250000e+01 : f32
    %70 = vector.broadcast %cst_41 : f32 to vector<8x1xf32>
    %71 = arith.mulf %70, %66 : vector<8x1xf32>
    %72 = vector.broadcast %71 : vector<8x1xf32> to vector<8x256xf32>
    %73 = arith.subf %69, %72 : vector<8x256xf32>
    %74 = arith.subf %58, %49 : vector<8x256xf32>
    %75 = vector.broadcast %19 : vector<8x1xf32> to vector<8x256xf32>
    %76 = arith.mulf %75, %58 : vector<8x256xf32>
    %cst_42 = arith.constant dense<0.000000e+00> : vector<8x256xf32>
    %77 = tpu.matmul %29, %74, %cst_42 {dimension_numbers = #tpu.dot_dimension_numbers<[1], [0], [0], [1], [0, 0, 1, 1], [], []>} : vector<8x8xf32>, vector<8x256xf32>, vector<8x256xf32> -> vector<8x256xf32>
    %78 = arith.addf %76, %77 : vector<8x256xf32>
    %79 = arith.addf %78, %73 : vector<8x256xf32>
    %80 = vector.broadcast %24 : vector<8x1xf32> to vector<8x256xf32>
    %81 = arith.addf %79, %80 : vector<8x256xf32>
    %cst_43 = arith.constant dense<0xFF800000> : vector<256xf32>
    %82 = vector.multi_reduction <maximumf>, %81, %cst_43 [0] : vector<8x256xf32> to vector<256xf32>
    %83 = vector.shape_cast %82 : vector<256xf32> to vector<1x256xf32>
    %84 = vector.broadcast %83 : vector<1x256xf32> to vector<8x256xf32>
    %85 = arith.subf %81, %84 : vector<8x256xf32>
    %86 = math.exp %85 : vector<8x256xf32>
    %cst_44 = arith.constant dense<0.000000e+00> : vector<256xf32>
    %87 = vector.multi_reduction <add>, %86, %cst_44 [0] : vector<8x256xf32> to vector<256xf32>
    %88 = vector.shape_cast %87 : vector<256xf32> to vector<1x256xf32>
    %89 = vector.broadcast %88 : vector<1x256xf32> to vector<8x256xf32>
    %90 = arith.divf %86, %89 : vector<8x256xf32>
    %cst_45 = arith.constant dense<0.000000e+00> : vector<8x256xf32>
    %91 = tpu.matmul %29, %90, %cst_45 {dimension_numbers = #tpu.dot_dimension_numbers<[1], [0], [0], [1], [0, 0, 1, 1], [], []>} : vector<8x8xf32>, vector<8x256xf32>, vector<8x256xf32> -> vector<8x256xf32>
    %cst_46 = arith.constant 1.000000e+00 : f32
    %92 = vector.broadcast %cst_46 : f32 to vector<8x256xf32>
    %93 = arith.subf %92, %91 : vector<8x256xf32>
    %94 = arith.mulf %93, %59 : vector<8x256xf32>
    %95 = arith.subf %90, %94 : vector<8x256xf32>
    %cst_47 = arith.constant dense<0.000000e+00> : vector<8x32xf32>
    %96 = tpu.matmul %95, %6, %cst_47 {dimension_numbers = #tpu.dot_dimension_numbers<[1], [0], [0], [1], [0, 0, 1, 1], [], []>} : vector<8x256xf32>, vector<256x32xf32>, vector<8x32xf32> -> vector<8x32xf32>
    %97 = vector.broadcast %7 : vector<1x32xf32> to vector<8x32xf32>
    %98 = arith.addf %96, %97 : vector<8x32xf32>
    %cst_48 = arith.constant 0.000000e+00 : f32
    %99 = vector.broadcast %cst_48 : f32 to vector<8x32xf32>
    %100 = arith.maximumf %98, %99 : vector<8x32xf32>
    %cst_49 = arith.constant dense<0.000000e+00> : vector<8x3xf32>
    %101 = tpu.matmul %90, %3, %cst_49 {dimension_numbers = #tpu.dot_dimension_numbers<[1], [0], [0], [1], [0, 0, 1, 1], [], []>} : vector<8x256xf32>, vector<256x3xf32>, vector<8x3xf32> -> vector<8x3xf32>
    %cst_50 = arith.constant dense<0.000000e+00> : vector<8xf32>
    %102 = vector.multi_reduction <add>, %90, %cst_50 [1] : vector<8x256xf32> to vector<8xf32>
    %103 = vector.shape_cast %102 : vector<8xf32> to vector<8x1xf32>
    %104 = vector.broadcast %103 : vector<8x1xf32> to vector<8x3xf32>
    %105 = arith.mulf %62, %104 : vector<8x3xf32>
    %106 = arith.subf %101, %105 : vector<8x3xf32>
    %cst_51 = arith.constant dense<0.000000e+00> : vector<8x32xf32>
    %107 = tpu.matmul %100, %10, %cst_51 {dimension_numbers = #tpu.dot_dimension_numbers<[1], [0], [0], [1], [0, 0, 1, 1], [], []>} : vector<8x32xf32>, vector<32x32xf32>, vector<8x32xf32> -> vector<8x32xf32>
    %cst_52 = arith.constant dense<0.000000e+00> : vector<8x32xf32>
    %108 = tpu.matmul %106, %11, %cst_52 {dimension_numbers = #tpu.dot_dimension_numbers<[1], [0], [0], [1], [0, 0, 1, 1], [], []>} : vector<8x3xf32>, vector<3x32xf32>, vector<8x32xf32> -> vector<8x32xf32>
    %109 = arith.addf %107, %108 : vector<8x32xf32>
    %cst_53 = arith.constant dense<0.000000e+00> : vector<8x32xf32>
    %110 = tpu.matmul %45, %12, %cst_53 {dimension_numbers = #tpu.dot_dimension_numbers<[1], [0], [0], [1], [0, 0, 1, 1], [], []>} : vector<8x32xf32>, vector<32x32xf32>, vector<8x32xf32> -> vector<8x32xf32>
    %111 = arith.addf %109, %110 : vector<8x32xf32>
    %112 = vector.broadcast %13 : vector<1x32xf32> to vector<8x32xf32>
    %113 = arith.addf %111, %112 : vector<8x32xf32>
    %114 = math.tanh %113 : vector<8x32xf32>
    %cst_54 = arith.constant dense<0.000000e+00> : vector<8x384xf32>
    %115 = tpu.matmul %114, %8, %cst_54 {dimension_numbers = #tpu.dot_dimension_numbers<[1], [0], [0], [1], [0, 0, 1, 1], [], []>} : vector<8x32xf32>, vector<32x384xf32>, vector<8x384xf32> -> vector<8x384xf32>
    %116 = vector.broadcast %9 : vector<1x384xf32> to vector<8x384xf32>
    %117 = arith.addf %115, %116 : vector<8x384xf32>
    %118 = vector.extract_strided_slice %117 {offsets = [0, 0], sizes = [8, 256], strides = [1, 1]} : vector<8x384xf32> to vector<8x256xf32>
    %119 = vector.extract_strided_slice %117 {offsets = [0, 256], sizes = [8, 3], strides = [1, 1]} : vector<8x384xf32> to vector<8x3xf32>
    %cst_55 = arith.constant 0.000000e+00 : f32
    %120 = vector.broadcast %cst_55 : f32 to vector<8x256xf32>
    %121 = arith.minimumf %118, %120 : vector<8x256xf32>
    %122 = math.absf %118 : vector<8x256xf32>
    %cst_56 = arith.constant 0.000000e+00 : f32
    %123 = vector.broadcast %cst_56 : f32 to vector<8x256xf32>
    %124 = arith.subf %123, %122 : vector<8x256xf32>
    %125 = math.exp %124 : vector<8x256xf32>
    %126 = math.log1p %125 : vector<8x256xf32>
    %127 = arith.subf %121, %126 : vector<8x256xf32>
    %128 = math.exp %127 : vector<8x256xf32>
    %129 = vector.broadcast %43 : f32 to vector<8x3xf32>
    %130 = arith.mulf %129, %106 : vector<8x3xf32>
    %131 = arith.addf %62, %130 : vector<8x3xf32>
    %132 = vector.shape_cast %17 : vector<8x1xi1> to vector<8x1xi1>
    %133 = vector.broadcast %132 : vector<8x1xi1> to vector<8x3xi1>
    %134 = arith.select %133, %119, %131 : vector<8x3xi1>, vector<8x3xf32>
    %cst_57 = arith.constant dense<0.000000e+00> : vector<8x256xf32>
    %135 = tpu.matmul %134, %1, %cst_57 {dimension_numbers = #tpu.dot_dimension_numbers<[1], [0], [0], [1], [0, 0, 1, 1], [], []>} : vector<8x3xf32>, vector<3x256xf32>, vector<8x256xf32> -> vector<8x256xf32>
    %136 = arith.mulf %134, %134 : vector<8x3xf32>
    %cst_58 = arith.constant dense<0.000000e+00> : vector<8xf32>
    %137 = vector.multi_reduction <add>, %136, %cst_58 [1] : vector<8x3xf32> to vector<8xf32>
    %138 = vector.shape_cast %137 : vector<8xf32> to vector<8x1xf32>
    %cst_59 = arith.constant 2.500000e+01 : f32
    %139 = vector.broadcast %cst_59 : f32 to vector<8x256xf32>
    %140 = arith.mulf %139, %135 : vector<8x256xf32>
    %141 = arith.addf %39, %140 : vector<8x256xf32>
    %cst_60 = arith.constant 1.250000e+01 : f32
    %142 = vector.broadcast %cst_60 : f32 to vector<8x1xf32>
    %143 = arith.mulf %142, %138 : vector<8x1xf32>
    %144 = vector.broadcast %143 : vector<8x1xf32> to vector<8x256xf32>
    %145 = arith.subf %141, %144 : vector<8x256xf32>
    %146 = arith.subf %127, %118 : vector<8x256xf32>
    %147 = vector.broadcast %19 : vector<8x1xf32> to vector<8x256xf32>
    %148 = arith.mulf %147, %127 : vector<8x256xf32>
    %cst_61 = arith.constant dense<0.000000e+00> : vector<8x256xf32>
    %149 = tpu.matmul %29, %146, %cst_61 {dimension_numbers = #tpu.dot_dimension_numbers<[1], [0], [0], [1], [0, 0, 1, 1], [], []>} : vector<8x8xf32>, vector<8x256xf32>, vector<8x256xf32> -> vector<8x256xf32>
    %150 = arith.addf %148, %149 : vector<8x256xf32>
    %151 = arith.addf %150, %145 : vector<8x256xf32>
    %152 = vector.broadcast %24 : vector<8x1xf32> to vector<8x256xf32>
    %153 = arith.addf %151, %152 : vector<8x256xf32>
    %cst_62 = arith.constant dense<0xFF800000> : vector<256xf32>
    %154 = vector.multi_reduction <maximumf>, %153, %cst_62 [0] : vector<8x256xf32> to vector<256xf32>
    %155 = vector.shape_cast %154 : vector<256xf32> to vector<1x256xf32>
    %156 = vector.broadcast %155 : vector<1x256xf32> to vector<8x256xf32>
    %157 = arith.subf %153, %156 : vector<8x256xf32>
    %158 = math.exp %157 : vector<8x256xf32>
    %cst_63 = arith.constant dense<0.000000e+00> : vector<256xf32>
    %159 = vector.multi_reduction <add>, %158, %cst_63 [0] : vector<8x256xf32> to vector<256xf32>
    %160 = vector.shape_cast %159 : vector<256xf32> to vector<1x256xf32>
    %161 = vector.broadcast %160 : vector<1x256xf32> to vector<8x256xf32>
    %162 = arith.divf %158, %161 : vector<8x256xf32>
    %c0_64 = arith.constant 0 : index
    %c0_65 = arith.constant 0 : index
    %c0_66 = arith.constant 0 : index
    %c0_67 = arith.constant 0 : index
    %163 = vector.load %arg13[%c0_64, %c0_65, %c0_66, %c0_67] : memref<1x2x8x256xf32, #tpu.memory_space<vmem>>, vector<1x1x8x256xf32>
    %164 = vector.shape_cast %163 : vector<1x1x8x256xf32> to vector<8x256xf32>
    %165 = vector.shape_cast %162 : vector<8x256xf32> to vector<1x1x8x256xf32>
    tpu.vector_store %arg13[%c0_64, %c0_65, %c0_66, %c0_67], %165 {strides = array<i32>} : memref<1x2x8x256xf32, #tpu.memory_space<vmem>>, vector<1x1x8x256xf32>,
    %c0_68 = arith.constant 0 : index
    %c0_69 = arith.constant 0 : index
    %c0_70 = arith.constant 0 : index
    %c0_71 = arith.constant 0 : index
    %166 = vector.load %arg14[%c0_68, %c0_69, %c0_70, %c0_71] : memref<1x2x8x256xf32, #tpu.memory_space<vmem>>, vector<1x1x8x256xf32>
    %167 = vector.shape_cast %166 : vector<1x1x8x256xf32> to vector<8x256xf32>
    %168 = vector.shape_cast %153 : vector<8x256xf32> to vector<1x1x8x256xf32>
    tpu.vector_store %arg14[%c0_68, %c0_69, %c0_70, %c0_71], %168 {strides = array<i32>} : memref<1x2x8x256xf32, #tpu.memory_space<vmem>>, vector<1x1x8x256xf32>,
    %c0_72 = arith.constant 0 : index
    %c0_73 = arith.constant 0 : index
    %c0_74 = arith.constant 0 : index
    %c0_75 = arith.constant 0 : index
    %169 = vector.load %arg15[%c0_72, %c0_73, %c0_74, %c0_75] : memref<1x2x8x256xf32, #tpu.memory_space<vmem>>, vector<1x1x8x256xf32>
    %170 = vector.shape_cast %169 : vector<1x1x8x256xf32> to vector<8x256xf32>
    %171 = vector.shape_cast %128 : vector<8x256xf32> to vector<1x1x8x256xf32>
    tpu.vector_store %arg15[%c0_72, %c0_73, %c0_74, %c0_75], %171 {strides = array<i32>} : memref<1x2x8x256xf32, #tpu.memory_space<vmem>>, vector<1x1x8x256xf32>,
    %c0_76 = arith.constant 0 : index
    %c0_77 = arith.constant 0 : index
    %c0_78 = arith.constant 0 : index
    %c0_79 = arith.constant 0 : index
    %172 = vector.load %arg16[%c0_76, %c0_77, %c0_78, %c0_79] : memref<1x2x8x3xf32, #tpu.memory_space<vmem>>, vector<1x1x8x3xf32>
    %173 = vector.shape_cast %172 : vector<1x1x8x3xf32> to vector<8x3xf32>
    %174 = vector.shape_cast %134 : vector<8x3xf32> to vector<1x1x8x3xf32>
    tpu.vector_store %arg16[%c0_76, %c0_77, %c0_78, %c0_79], %174 {strides = array<i32>} : memref<1x2x8x3xf32, #tpu.memory_space<vmem>>, vector<1x1x8x3xf32>,
    %cst_80 = arith.constant dense<0.000000e+00> : vector<8x256xf32>
    %175 = tpu.matmul %29, %162, %cst_80 {dimension_numbers = #tpu.dot_dimension_numbers<[1], [0], [0], [1], [0, 0, 1, 1], [], []>} : vector<8x8xf32>, vector<8x256xf32>, vector<8x256xf32> -> vector<8x256xf32>
    %cst_81 = arith.constant 1.000000e+00 : f32
    %176 = vector.broadcast %cst_81 : f32 to vector<8x256xf32>
    %177 = arith.subf %176, %175 : vector<8x256xf32>
    %178 = arith.mulf %177, %128 : vector<8x256xf32>
    %179 = arith.subf %162, %178 : vector<8x256xf32>
    %cst_82 = arith.constant dense<0.000000e+00> : vector<8x32xf32>
    %180 = tpu.matmul %179, %6, %cst_82 {dimension_numbers = #tpu.dot_dimension_numbers<[1], [0], [0], [1], [0, 0, 1, 1], [], []>} : vector<8x256xf32>, vector<256x32xf32>, vector<8x32xf32> -> vector<8x32xf32>
    %181 = vector.broadcast %7 : vector<1x32xf32> to vector<8x32xf32>
    %182 = arith.addf %180, %181 : vector<8x32xf32>
    %cst_83 = arith.constant 0.000000e+00 : f32
    %183 = vector.broadcast %cst_83 : f32 to vector<8x32xf32>
    %184 = arith.maximumf %182, %183 : vector<8x32xf32>
    %cst_84 = arith.constant dense<0.000000e+00> : vector<8x3xf32>
    %185 = tpu.matmul %162, %3, %cst_84 {dimension_numbers = #tpu.dot_dimension_numbers<[1], [0], [0], [1], [0, 0, 1, 1], [], []>} : vector<8x256xf32>, vector<256x3xf32>, vector<8x3xf32> -> vector<8x3xf32>
    %cst_85 = arith.constant dense<0.000000e+00> : vector<8xf32>
    %186 = vector.multi_reduction <add>, %162, %cst_85 [1] : vector<8x256xf32> to vector<8xf32>
    %187 = vector.shape_cast %186 : vector<8xf32> to vector<8x1xf32>
    %188 = vector.broadcast %187 : vector<8x1xf32> to vector<8x3xf32>
    %189 = arith.mulf %134, %188 : vector<8x3xf32>
    %190 = arith.subf %185, %189 : vector<8x3xf32>
    %cst_86 = arith.constant dense<0.000000e+00> : vector<8x32xf32>
    %191 = tpu.matmul %184, %10, %cst_86 {dimension_numbers = #tpu.dot_dimension_numbers<[1], [0], [0], [1], [0, 0, 1, 1], [], []>} : vector<8x32xf32>, vector<32x32xf32>, vector<8x32xf32> -> vector<8x32xf32>
    %cst_87 = arith.constant dense<0.000000e+00> : vector<8x32xf32>
    %192 = tpu.matmul %190, %11, %cst_87 {dimension_numbers = #tpu.dot_dimension_numbers<[1], [0], [0], [1], [0, 0, 1, 1], [], []>} : vector<8x3xf32>, vector<3x32xf32>, vector<8x32xf32> -> vector<8x32xf32>
    %193 = arith.addf %191, %192 : vector<8x32xf32>
    %cst_88 = arith.constant dense<0.000000e+00> : vector<8x32xf32>
    %194 = tpu.matmul %114, %12, %cst_88 {dimension_numbers = #tpu.dot_dimension_numbers<[1], [0], [0], [1], [0, 0, 1, 1], [], []>} : vector<8x32xf32>, vector<32x32xf32>, vector<8x32xf32> -> vector<8x32xf32>
    %195 = arith.addf %193, %194 : vector<8x32xf32>
    %196 = vector.broadcast %13 : vector<1x32xf32> to vector<8x32xf32>
    %197 = arith.addf %195, %196 : vector<8x32xf32>
    %198 = math.tanh %197 : vector<8x32xf32>
    %cst_89 = arith.constant dense<0.000000e+00> : vector<8x384xf32>
    %199 = tpu.matmul %198, %8, %cst_89 {dimension_numbers = #tpu.dot_dimension_numbers<[1], [0], [0], [1], [0, 0, 1, 1], [], []>} : vector<8x32xf32>, vector<32x384xf32>, vector<8x384xf32> -> vector<8x384xf32>
    %200 = vector.broadcast %9 : vector<1x384xf32> to vector<8x384xf32>
    %201 = arith.addf %199, %200 : vector<8x384xf32>
    %202 = vector.extract_strided_slice %201 {offsets = [0, 0], sizes = [8, 256], strides = [1, 1]} : vector<8x384xf32> to vector<8x256xf32>
    %203 = vector.extract_strided_slice %201 {offsets = [0, 256], sizes = [8, 3], strides = [1, 1]} : vector<8x384xf32> to vector<8x3xf32>
    %cst_90 = arith.constant 0.000000e+00 : f32
    %204 = vector.broadcast %cst_90 : f32 to vector<8x256xf32>
    %205 = arith.minimumf %202, %204 : vector<8x256xf32>
    %206 = math.absf %202 : vector<8x256xf32>
    %cst_91 = arith.constant 0.000000e+00 : f32
    %207 = vector.broadcast %cst_91 : f32 to vector<8x256xf32>
    %208 = arith.subf %207, %206 : vector<8x256xf32>
    %209 = math.exp %208 : vector<8x256xf32>
    %210 = math.log1p %209 : vector<8x256xf32>
    %211 = arith.subf %205, %210 : vector<8x256xf32>
    %212 = math.exp %211 : vector<8x256xf32>
    %213 = vector.broadcast %43 : f32 to vector<8x3xf32>
    %214 = arith.mulf %213, %190 : vector<8x3xf32>
    %215 = arith.addf %134, %214 : vector<8x3xf32>
    %216 = vector.shape_cast %17 : vector<8x1xi1> to vector<8x1xi1>
    %217 = vector.broadcast %216 : vector<8x1xi1> to vector<8x3xi1>
    %218 = arith.select %217, %203, %215 : vector<8x3xi1>, vector<8x3xf32>
    %cst_92 = arith.constant dense<0.000000e+00> : vector<8x256xf32>
    %219 = tpu.matmul %218, %1, %cst_92 {dimension_numbers = #tpu.dot_dimension_numbers<[1], [0], [0], [1], [0, 0, 1, 1], [], []>} : vector<8x3xf32>, vector<3x256xf32>, vector<8x256xf32> -> vector<8x256xf32>
    %220 = arith.mulf %218, %218 : vector<8x3xf32>
    %cst_93 = arith.constant dense<0.000000e+00> : vector<8xf32>
    %221 = vector.multi_reduction <add>, %220, %cst_93 [1] : vector<8x3xf32> to vector<8xf32>
    %222 = vector.shape_cast %221 : vector<8xf32> to vector<8x1xf32>
    %cst_94 = arith.constant 2.500000e+01 : f32
    %223 = vector.broadcast %cst_94 : f32 to vector<8x256xf32>
    %224 = arith.mulf %223, %219 : vector<8x256xf32>
    %225 = arith.addf %39, %224 : vector<8x256xf32>
    %cst_95 = arith.constant 1.250000e+01 : f32
    %226 = vector.broadcast %cst_95 : f32 to vector<8x1xf32>
    %227 = arith.mulf %226, %222 : vector<8x1xf32>
    %228 = vector.broadcast %227 : vector<8x1xf32> to vector<8x256xf32>
    %229 = arith.subf %225, %228 : vector<8x256xf32>
    %230 = arith.subf %211, %202 : vector<8x256xf32>
    %231 = vector.broadcast %19 : vector<8x1xf32> to vector<8x256xf32>
    %232 = arith.mulf %231, %211 : vector<8x256xf32>
    %cst_96 = arith.constant dense<0.000000e+00> : vector<8x256xf32>
    %233 = tpu.matmul %29, %230, %cst_96 {dimension_numbers = #tpu.dot_dimension_numbers<[1], [0], [0], [1], [0, 0, 1, 1], [], []>} : vector<8x8xf32>, vector<8x256xf32>, vector<8x256xf32> -> vector<8x256xf32>
    %234 = arith.addf %232, %233 : vector<8x256xf32>
    %235 = arith.addf %234, %229 : vector<8x256xf32>
    %236 = vector.broadcast %24 : vector<8x1xf32> to vector<8x256xf32>
    %237 = arith.addf %235, %236 : vector<8x256xf32>
    %cst_97 = arith.constant dense<0xFF800000> : vector<256xf32>
    %238 = vector.multi_reduction <maximumf>, %237, %cst_97 [0] : vector<8x256xf32> to vector<256xf32>
    %239 = vector.shape_cast %238 : vector<256xf32> to vector<1x256xf32>
    %240 = vector.broadcast %239 : vector<1x256xf32> to vector<8x256xf32>
    %241 = arith.subf %237, %240 : vector<8x256xf32>
    %242 = math.exp %241 : vector<8x256xf32>
    %cst_98 = arith.constant dense<0.000000e+00> : vector<256xf32>
    %243 = vector.multi_reduction <add>, %242, %cst_98 [0] : vector<8x256xf32> to vector<256xf32>
    %244 = vector.shape_cast %243 : vector<256xf32> to vector<1x256xf32>
    %245 = vector.broadcast %244 : vector<1x256xf32> to vector<8x256xf32>
    %246 = arith.divf %242, %245 : vector<8x256xf32>
    %c0_99 = arith.constant 0 : index
    %c1 = arith.constant 1 : index
    %c0_100 = arith.constant 0 : index
    %c0_101 = arith.constant 0 : index
    %247 = vector.load %arg13[%c0_99, %c1, %c0_100, %c0_101] : memref<1x2x8x256xf32, #tpu.memory_space<vmem>>, vector<1x1x8x256xf32>
    %248 = vector.shape_cast %247 : vector<1x1x8x256xf32> to vector<8x256xf32>
    %249 = vector.shape_cast %246 : vector<8x256xf32> to vector<1x1x8x256xf32>
    tpu.vector_store %arg13[%c0_99, %c1, %c0_100, %c0_101], %249 {strides = array<i32>} : memref<1x2x8x256xf32, #tpu.memory_space<vmem>>, vector<1x1x8x256xf32>,
    %c0_102 = arith.constant 0 : index
    %c1_103 = arith.constant 1 : index
    %c0_104 = arith.constant 0 : index
    %c0_105 = arith.constant 0 : index
    %250 = vector.load %arg14[%c0_102, %c1_103, %c0_104, %c0_105] : memref<1x2x8x256xf32, #tpu.memory_space<vmem>>, vector<1x1x8x256xf32>
    %251 = vector.shape_cast %250 : vector<1x1x8x256xf32> to vector<8x256xf32>
    %252 = vector.shape_cast %237 : vector<8x256xf32> to vector<1x1x8x256xf32>
    tpu.vector_store %arg14[%c0_102, %c1_103, %c0_104, %c0_105], %252 {strides = array<i32>} : memref<1x2x8x256xf32, #tpu.memory_space<vmem>>, vector<1x1x8x256xf32>,
    %c0_106 = arith.constant 0 : index
    %c1_107 = arith.constant 1 : index
    %c0_108 = arith.constant 0 : index
    %c0_109 = arith.constant 0 : index
    %253 = vector.load %arg15[%c0_106, %c1_107, %c0_108, %c0_109] : memref<1x2x8x256xf32, #tpu.memory_space<vmem>>, vector<1x1x8x256xf32>
    %254 = vector.shape_cast %253 : vector<1x1x8x256xf32> to vector<8x256xf32>
    %255 = vector.shape_cast %212 : vector<8x256xf32> to vector<1x1x8x256xf32>
    tpu.vector_store %arg15[%c0_106, %c1_107, %c0_108, %c0_109], %255 {strides = array<i32>} : memref<1x2x8x256xf32, #tpu.memory_space<vmem>>, vector<1x1x8x256xf32>,
    %c0_110 = arith.constant 0 : index
    %c1_111 = arith.constant 1 : index
    %c0_112 = arith.constant 0 : index
    %c0_113 = arith.constant 0 : index
    %256 = vector.load %arg16[%c0_110, %c1_111, %c0_112, %c0_113] : memref<1x2x8x3xf32, #tpu.memory_space<vmem>>, vector<1x1x8x3xf32>
    %257 = vector.shape_cast %256 : vector<1x1x8x3xf32> to vector<8x3xf32>
    %258 = vector.shape_cast %218 : vector<8x3xf32> to vector<1x1x8x3xf32>
    tpu.vector_store %arg16[%c0_110, %c1_111, %c0_112, %c0_113], %258 {strides = array<i32>} : memref<1x2x8x3xf32, #tpu.memory_space<vmem>>, vector<1x1x8x3xf32>,
    return
  }
  func.func @transform_0(%arg0: i32) -> (i32, i32, i32) {
    %c0_i32 = arith.constant 0 : i32
    %c0_i32_0 = arith.constant 0 : i32
    %c0_i32_1 = arith.constant 0 : i32
    return %arg0, %c0_i32, %c0_i32_0 : i32, i32, i32
  }
  func.func @transform_1(%arg0: i32) -> (i32, i32, i32) {
    %c0_i32 = arith.constant 0 : i32
    %c0_i32_0 = arith.constant 0 : i32
    %c0_i32_1 = arith.constant 0 : i32
    return %arg0, %c0_i32, %c0_i32_0 : i32, i32, i32
  }
  func.func @transform_2(%arg0: i32) -> (i32, i32, i32) {
    %c0_i32 = arith.constant 0 : i32
    %c0_i32_0 = arith.constant 0 : i32
    %c0_i32_1 = arith.constant 0 : i32
    return %arg0, %c0_i32, %c0_i32_0 : i32, i32, i32
  }
  func.func @transform_3(%arg0: i32) -> (i32, i32) {
    %c0_i32 = arith.constant 0 : i32
    %c0_i32_0 = arith.constant 0 : i32
    %c0_i32_1 = arith.constant 0 : i32
    return %c0_i32, %c0_i32_0 : i32, i32
  }
  func.func @transform_4(%arg0: i32) -> (i32, i32) {
    %c0_i32 = arith.constant 0 : i32
    %c0_i32_0 = arith.constant 0 : i32
    %c0_i32_1 = arith.constant 0 : i32
    return %c0_i32, %c0_i32_0 : i32, i32
  }
  func.func @transform_5(%arg0: i32) -> (i32, i32) {
    %c0_i32 = arith.constant 0 : i32
    %c0_i32_0 = arith.constant 0 : i32
    %c0_i32_1 = arith.constant 0 : i32
    return %c0_i32, %c0_i32_0 : i32, i32
  }
  func.func @transform_6(%arg0: i32) -> (i32, i32) {
    %c0_i32 = arith.constant 0 : i32
    %c0_i32_0 = arith.constant 0 : i32
    %c0_i32_1 = arith.constant 0 : i32
    return %c0_i32, %c0_i32_0 : i32, i32
  }
  func.func @transform_7(%arg0: i32) -> (i32, i32) {
    %c0_i32 = arith.constant 0 : i32
    %c0_i32_0 = arith.constant 0 : i32
    %c0_i32_1 = arith.constant 0 : i32
    return %c0_i32, %c0_i32_0 : i32, i32
  }
  func.func @transform_8(%arg0: i32) -> (i32, i32) {
    %c0_i32 = arith.constant 0 : i32
    %c0_i32_0 = arith.constant 0 : i32
    %c0_i32_1 = arith.constant 0 : i32
    return %c0_i32, %c0_i32_0 : i32, i32
  }
  func.func @transform_9(%arg0: i32) -> (i32, i32) {
    %c0_i32 = arith.constant 0 : i32
    %c0_i32_0 = arith.constant 0 : i32
    %c0_i32_1 = arith.constant 0 : i32
    return %c0_i32, %c0_i32_0 : i32, i32
  }
  func.func @transform_10(%arg0: i32) -> (i32, i32) {
    %c0_i32 = arith.constant 0 : i32
    %c0_i32_0 = arith.constant 0 : i32
    %c0_i32_1 = arith.constant 0 : i32
    return %c0_i32, %c0_i32_0 : i32, i32
  }
  func.func @transform_11(%arg0: i32) -> (i32, i32) {
    %c0_i32 = arith.constant 0 : i32
    %c0_i32_0 = arith.constant 0 : i32
    %c0_i32_1 = arith.constant 0 : i32
    return %c0_i32, %c0_i32_0 : i32, i32
  }
  func.func @transform_12(%arg0: i32) -> (i32, i32, i32, i32) {
    %c0_i32 = arith.constant 0 : i32
    %c0_i32_0 = arith.constant 0 : i32
    %c0_i32_1 = arith.constant 0 : i32
    %c0_i32_2 = arith.constant 0 : i32
    return %arg0, %c0_i32, %c0_i32_0, %c0_i32_1 : i32, i32, i32, i32
  }
  func.func @transform_13(%arg0: i32) -> (i32, i32, i32, i32) {
    %c0_i32 = arith.constant 0 : i32
    %c0_i32_0 = arith.constant 0 : i32
    %c0_i32_1 = arith.constant 0 : i32
    %c0_i32_2 = arith.constant 0 : i32
    return %arg0, %c0_i32, %c0_i32_0, %c0_i32_1 : i32, i32, i32, i32
  }
  func.func @transform_14(%arg0: i32) -> (i32, i32, i32, i32) {
    %c0_i32 = arith.constant 0 : i32
    %c0_i32_0 = arith.constant 0 : i32
    %c0_i32_1 = arith.constant 0 : i32
    %c0_i32_2 = arith.constant 0 : i32
    return %arg0, %c0_i32, %c0_i32_0, %c0_i32_1 : i32, i32, i32, i32
  }
  func.func @transform_15(%arg0: i32) -> (i32, i32, i32, i32) {
    %c0_i32 = arith.constant 0 : i32
    %c0_i32_0 = arith.constant 0 : i32
    %c0_i32_1 = arith.constant 0 : i32
    %c0_i32_2 = arith.constant 0 : i32
    return %arg0, %c0_i32, %c0_i32_0, %c0_i32_1 : i32, i32, i32, i32
  }
}

</mosaic_0001>

<bundles_post_ra>
// kernel: model_forward.1
= control target key start
LH: loop header
LB: loop body
LE: loop exit
PB: predicated region body
PF: predicated region fallthrough
CT: control target
= control target key end

     0   :  { %s3661_s20 = smov 0   ;;  %s4336_s0 = inlined_call_operand.vmem [shape: f32[2,3,256], index: 0, kind: input, shape index: {}]   ;;  %s4337_s1 = inlined_call_operand.vmem [shape: f32[2,256,3], index: 1, kind: input, shape index: {}]   ;;  %s4338_s2 = inlined_call_operand.vmem [shape: f32[2,1,3], index: 2, kind: input, shape index: {}]   ;;  %s4339_s3 = inlined_call_operand.vmem [shape: f32[256,32], index: 3, kind: input, shape index: {}]   ;;  %s4340_s4 = inlined_call_operand.vmem [shape: f32[1,32], index: 4, kind: input, shape index: {}]   ;;  %s4341_s5 = inlined_call_operand.vmem [shape: f32[32,384], index: 5, kind: input, shape index: {}]   ;;  %s4342_s6 = inlined_call_operand.vmem [shape: f32[1,384], index: 6, kind: input, shape index: {}]   ;;  %s4343_s7 = inlined_call_operand.vmem [shape: f32[32,32], index: 7, kind: input, shape index: {}]   ;;  %s4344_s8 = inlined_call_operand.vmem [shape: f32[3,32], index: 8, kind: input, shape index: {}]   ;;  %s4345_s9 = inlined_call_operand.vmem [shape: f32[32,32], index: 9, kind: input, shape index: {}]   ;;  %s4346_s10 = inlined_call_operand.vmem [shape: f32[1,32], index: 10, kind: input, shape index: {}]   ;;  %s4347_s11 = inlined_call_operand.<no memory space> [shape: f32[1,1], index: 11, kind: input, shape index: {}]   ;;  %s4348_s12 = inlined_call_operand.vmem [shape: f32[2,2,8,256], index: 12, kind: output, shape index: {0}]   ;;  %s4349_s13 = inlined_call_operand.vmem [shape: f32[2,2,8,256], index: 13, kind: output, shape index: {1}]   ;;  %s4350_s14 = inlined_call_operand.vmem [shape: f32[2,2,8,256], index: 14, kind: output, shape index: {2}]   ;;  %s4351_s15 = inlined_call_operand.vmem [shape: f32[2,2,8,3], index: 15, kind: output, shape index: {3}]  }
   0x1   :  { %21 = sst [smem:[#allocation2]] %s4347_s11 }
   0x2 LB: > { %s2966_s21 = sadd.s32 4294967295, %s3572_s20   ;;  %p2970_p0 = scmp.ge.s32.totalorder %s3572_s20, 1  ;;  %s3572_s20 = sphi %s3661_s20, %s27_s20  }
   0x3   : > { %p463_p1 = scmp.lt.s32.totalorder %s3572_s20, 3 }
   0x5   : > { %p464_p2 = pnand %p2970_p0, %p463_p1 }
   0x7   : > { %467 = sbr.rel (%p464_p2) target bundleno = 2941 (0xb7d), region = 68 }
   0xe   : > { %v635_v0 = vld [vmem:[%s4341_s5 + $0x8] sm:$0xff]  ;;  %v638_v1 = vld [vmem:[%s4341_s5 + $0x20] sm:$0xff]  ;;  %v636_v2 = vld [vmem:[%s4341_s5 + $0x10] sm:$0xff]  ;;  %v4352_v3 = vmov 0.0|0.0   ;;  %vm3575_vm0 = vmmov 0   ;;  %v4357_v8 = vmov 0.0   ;;  %v658_v22 = vlaneseq }
   0xf   : > { %3302 = vmatprep.subr.bf16.mxu1 %v4352_v3  ;;  %v3679_v4 = vpack.c.bf16 %v638_v1, %v635_v0  ;;  %v639_v5 = vld [vmem:[%s4341_s5 + $0x28] sm:$0xff]  ;;  %v634_v6 = vld [vmem:[%s4341_s5] sm:$0xff]  ;;  %v637_v7 = vld [vmem:[%s4341_s5 + $0x18] sm:$0xff]  ;;  %3215 = vmatprep.mubr.msk.f32.mxu1 %vm3575_vm0, %v4357_v8  ;;  %p534_p3 = scmp.lt.s32.totalorder %s2966_s21, 1  ;;  %vm674_vm1 = vcmask 1042432   ;;  %vm902_vm3 = vcmask 23552  }
  0x10   : > { %v3692_v9 = vpack.c.bf16 %v639_v5, %v636_v2  ;;  %v3694_v10 = vpack.c.bf16 %v637_v7, %v634_v6  ;;  %v641_v11 = vld [vmem:[%s4341_s5 + $0x38] sm:$0xff]  ;;  %v644_v12 = vld [vmem:[%s4341_s5 + $0x50] sm:$0xff]  ;;  %v642_v13 = vld [vmem:[%s4341_s5 + $0x40] sm:$0xff]  ;;  %787 = vmatprep.mubr.f32.mxu0 %v4357_v8  ;;  %v3755_v23 = vshrl.u32 %v658_v22, 7  ;;  %v666_v62 = vand.u32 127, %v658_v22  ;;  %s657_s27 = sld [smem:[#allocation2]] }
  0x11   : > { %3295 = vmatprep.subr.bf16.mxu0 %v3679_v4  ;;  %v3707_v14 = vpack.c.bf16 %v644_v12, %v641_v11  ;;  %v645_v15 = vld [vmem:[%s4341_s5 + $0x58] sm:$0xff]  ;;  %v640_v16 = vld [vmem:[%s4341_s5 + $0x30] sm:$0xff]  ;;  %v643_v17 = vld [vmem:[%s4341_s5 + $0x48] sm:$0xff]  ;;  %s4420_s21 = smov (!%p534_p3, %s2966_s21), 1  ;;  %vm996_vm7 = vcmask 64512   ;;  %vm719_vm9 = vcmask 261120  }
  0x12   : > { %4377 = vst [vmem:[#allocation3_spill] sm:$0xff] %v3692_v9  ;;  %4378 = vst [vmem:[#allocation4_spill] sm:$0xff] %v3694_v10  ;;  %3304 = vmatpush3.bf16.msra.mxu1 %v3692_v9  ;;  %3297 = vmatpush1.bf16.msra.mxu0 %v3694_v10  ;;  %v3720_v18 = vpack.c.bf16 %v645_v15, %v642_v13  ;;  %v3722_v19 = vpack.c.bf16 %v643_v17, %v640_v16  ;;  %s3022_s16 = sshll.u32 %s4420_s21, 3  ;;  %v714_v24 = vsub.s32 2, %v3755_v23  ;;  %v646_v26 = vld [vmem:[%s4342_s6] sm:$0x7]  ;;  %s546_s25 = scalar_lea.vmem %s4338_s2, %s4420_s21 }
  0x13   : > { %4379 = vst [vmem:[#allocation5_spill] sm:$0xff] %v3707_v14  ;;  %3305 = vmatprep.subr.bf16.mxu1 %v4352_v3  ;;  %3299 = vmatprep.subr.bf16.mxu0 %v3707_v14  ;;  %s3742_s19 = scalar_lea.vmem %s4336_s0, %s3022_s16  ;;  %4383 = vst [vmem:[#allocation9_spill] sm:$0xff] %v3755_v23  ;;  %v706_v25 = vsub.s32 0, %v3755_v23  ;;  %v710_v27 = vsub.s32 1, %v3755_v23  ;;  %v2985_v31 = vld [vmem:[%s546_s25] ss:$0 sm:$0xff]  ;;  %vm667_vm6 = vcmp.lt.s32.totalorder %v666_v62, %v3755_v23 }
  0x14   : > { %4380 = vst [vmem:[#allocation6_spill] sm:$0xff] %v3720_v18  ;;  %4381 = vst [vmem:[#allocation7_spill] sm:$0xff] %v3722_v19  ;;  %v3745_v20 = vld [vmem:[%s3742_s19] sm:$0x77]  ;;  %v3767_v28 = vrot.slane %v646_v26, %v714_v24  ;;  %vm660_vm2 = vcmp.lt.s32.totalorder %v3755_v23, 4  ;;  %v3795_v15 = vsel %vm667_vm6, 1.0, %v4357_v8 }
  0x15   : > { %v3749_v21 = vcombine.high %v3745_v20, %v3745_v20  ;;  %v3769_v29 = vrot.slane %v646_v26, %v706_v25  ;;  %v3771_v30 = vrot.slane %v646_v26, %v710_v27  ;;  %v670_v16 = vmul.f32 %v3745_v20, %v3745_v20  ;;  %s3023_s26 = sshll.u32 %s4420_s21, 8  ;;  %s4193_s18 = sshll.u32 %s4420_s21, 5 }
  0x16   : > { %3307 = vmatpush3.bf16.msra.mxu1 %v3720_v18  ;;  %3301 = vmatpush1.bf16.msra.mxu0 %v3722_v19  ;;  %4384 = vst [vmem:[#allocation10_spill] sm:$0xff] %v3767_v28  ;;  %vm663_vm8 = vcmp.lt.s32.totalorder %v3755_v23, 5  ;;  %s3827_s29 = scalar_lea.vmem %s4337_s1, %s3023_s26  ;;  %s702_s28 = smul.f32 0.00390625, %s657_s27 }
  0x17   : > { %4382 = vst [vmem:[#allocation8_spill] sm:$0xff] %v3749_v21  ;;  %2986 = vmatprep.subr.msk.mxu0 %vm674_vm1, %v3749_v21  ;;  %4385 = vst [vmem:[#allocation11_spill] sm:$0xff] %v3769_v29  ;;  %v672_v17 = vcombine.high %v670_v16, %v670_v16  ;;  %v675_v24 = vsel %vm674_vm1, %v670_v16, 0.0  ;;  %s4200_s11 = scalar_lea.vmem %s4350_s14, %s4193_s18  ;;  %s4232_s25 = scalar_lea.vmem %s4349_s13, %s4193_s18 }
  0x18   : > { %4386 = vst [vmem:[#allocation12_spill] sm:$0xff] %v3771_v30  ;;  %v676_v27 = vrot.slane %v675_v24, 4 }
  0x19   : > { %3216 = vmatmul.mubr.f32.vlgmr.msra.gmra.mrb[0].mxu1 %v4357_v8  ;;  %788 = vmatmul.mubr.f32.vlgmr.msra.gmra.mrb[0].mxu0 %v4357_v8  ;;  %v682_v26 = vsel %vm674_vm1, %v672_v17, 0.0 }
  0x1a   : > { %974 = vmatprep.mubr.f32.mxu0 %v4357_v8  ;;  %1064 = vmatprep.mubr.f32.mxu1 %v4357_v8 }
  0x1b   : > { %2987 = vmatpush1.msk.msra.mxu0 %vm674_vm1, %v3745_v20 }
  0xec   : > { %v860_v32 = vpop.f32.mrb[0].mxu1  ;;  %v789_v33 = vpop.f32.mrb[0].mxu0 }
  0xed   : > { %v861_v34 = vadd.f32 %v860_v32, %v3767_v28  ;;  %v790_v35 = vadd.f32 %v789_v33, %v3769_v29  ;;  %v791_v36 = vpop.f32.mrb[1].mxu0  ;;  %v3217_v37 = vpop.f32.mrb[1].mxu1  ;;  %v677_v32 = vadd.f32 %v676_v27, %v675_v24 }
  0xee   : > { %v792_v38 = vadd.f32 %v791_v36, %v3771_v30 }
  0xef   : > { %v3779_v39 = vsel %vm660_vm2, %v861_v34, %v2985_v31  ;;  %v866_v40 = vand.u32 2147483647, %v790_v35  ;;  %v864_v63 = vmin.f32 %v790_v35, 0.0  ;;  %v683_v31 = vrot.slane %v682_v26, 4 }
  0xf0   : > { %v867_v41 = vand.u32 2147483647, %v792_v38  ;;  %2988 = vmatmul.mubr.msk.f32.vlgmr.msra.gmra.mrb[2].mxu0 %vm902_vm3, %v3779_v39  ;;  %v981_v42 = vmul.f32 %v3779_v39, %v3779_v39  ;;  %v865_v5 = vmin.f32 %v792_v38, 0.0  ;;  %v678_v34 = vrot.slane %v677_v32, 2 }
  0xf1   : > { %v868_v43 = vsub.f32 0.0, %v866_v40  ;;  %1175 = vmatprep.mubr.f32.mxu0 %v4357_v8  ;;  %v684_v33 = vadd.f32 %v683_v31, %v682_v26 }
  0xf2   : > { %v869_v44 = vsub.f32 0.0, %v867_v41  ;;  %v982_v45 = vsel %vm902_vm3, %v981_v42, 0.0  ;;  %v679_v36 = vadd.f32 %v678_v34, %v677_v32 }
  0xf3   : > { %v870_v46 = vmul.f32 1.442695, %v868_v43  ;;  %983 = vadd.xlane.f32.xlu0 %v982_v45 }
  0xf4   : > { %v872_v47 = vmul.f32 1.442695, %v869_v44 }
  0xf5   : > { %3501 = vpow2.f32 %v870_v46 }
  0xf6   : > { %3503 = vpow2.f32 %v872_v47 }
  0xff   : > { %v3502_v48 = vpop.eup %3501 }
 0x100   : > { %v3504_v49 = vpop.eup %3503  ;;  %v874_v50 = vadd.f32 1.0, %v3502_v48  ;;  %v877_v52 = vmul.f32 -0.5, %v3502_v48  ;;  %v880_v55 = vand.u32 2147483647, %v3502_v48 }
 0x101   : > { %v883_v51 = vadd.f32 1.0, %v3504_v49  ;;  %v886_v53 = vmul.f32 -0.5, %v3504_v49  ;;  %v889_v57 = vand.u32 2147483647, %v3504_v49 }
 0x102   : > { %3505 = vlog2.f32 %v874_v50  ;;  %v878_v54 = vadd.f32 1.0, %v877_v52  ;;  %vm881_vm4 = vcmp.lt.f32.partialorder %v880_v55, 0.0004427343  ;;  %v3810_v50 = vsel %vm660_vm2, 1.0, %v4357_v8 }
 0x103   : > { %3507 = vlog2.f32 %v883_v51  ;;  %v887_v56 = vadd.f32 1.0, %v886_v53  ;;  %vm890_vm5 = vcmp.lt.f32.partialorder %v889_v57, 0.0004427343 }
 0x104   : > { %v879_v61 = vmul.f32 %v3502_v48, %v878_v54 }
 0x105   : > { %v888_v1 = vmul.f32 %v3504_v49, %v887_v56 }
 0x10c   : > { %v3506_v58 = vpop.eup %3505 }
 0x10d   : > { %v3508_v59 = vpop.eup %3507  ;;  %v876_v60 = vmul.f32 0.6931472, %v3506_v58 }
 0x10e   : > { %v885_v0 = vmul.f32 0.6931472, %v3508_v59 }
 0x10f   : > { %v882_v2 = vsel %vm881_vm4, %v879_v61, %v876_v60  ;;  %v3577_v60 = vmov -1e+30  }
 0x110   : > { %v3787_v6 = vsub.f32 %v864_v63, %v882_v2  ;;  %v891_v7 = vsel %vm890_vm5, %v888_v1, %v885_v0  ;;  %v3819_v61 = vsel %vm663_vm8, 0.0, %v3577_v60  ;;  %v568_v60 = vld [vmem:[%s3827_s29] sm:$0xff] }
 0x111   : > { %v3789_v11 = vsub.f32 %v865_v5, %v891_v7 }
 0x112   : > { %v992_v13 = vsub.f32 %v3787_v6, %v790_v35  ;;  %v685_v35 = vrot.slane %v684_v33, 2  ;;  %v994_v54 = vmul.f32 %v3810_v50, %v3787_v6 }
 0x113   : > { %v993_v12 = vsub.f32 %v3789_v11, %v792_v38  ;;  %v680_v38 = vrot.slane %v679_v36, 1  ;;  %v995_v56 = vmul.f32 %v3810_v50, %v3789_v11 }
 0x114   : > { %v686_v37 = vadd.f32 %v685_v35, %v684_v33 }
 0x115   : > { %1000 = vmatprep.subr.mxu1 %v993_v12  ;;  %v681_v41 = vadd.f32 %v680_v38, %v679_v36 }
 0x116   : > { %1001 = vmatpush1.msra.mxu1 %v992_v13  ;;  %v687_v40 = vrot.slane %v686_v37, 1 }
 0x117   : > { %2989 = vmatmul.mubr.msk.f32.vlgmr.msra.gmra.mrb[2].mxu1 %vm996_vm7, %v3795_v15  ;;  %v689_v43 = vmul.f32 12.5, %v681_v41 }
 0x118   : > { %v688_v42 = vadd.f32 %v687_v40, %v686_v37 }
 0x119   : > { %v3803_v45 = vsub.f32 2.0714982, %v689_v43 }
 0x11a   : > { %v690_v44 = vmul.f32 12.5, %v688_v42 }
 0x11c   : > { %v3805_v47 = vsub.f32 2.0714982, %v690_v44 }
 0x180   : > { %v984_v49 = vpop.xlane.xlu0 %983 }
 0x181   : > { %v989_v53 = vmul.f32 12.5, %v984_v49 }
 0x1c3   : > { %v976_v22 = vpop.f32.mrb[2].mxu0 }
 0x1c4   : > { %v978_v25 = vpop.f32.mrb[3].mxu0  ;;  %v985_v46 = vmul.f32 25.0, %v976_v22 }
 0x1c5   : > { %v986_v48 = vmul.f32 25.0, %v978_v25 }
 0x1c6   : > { %v987_v51 = vadd.f32 %v985_v46, %v3803_v45 }
 0x1c7   : > { %v988_v52 = vadd.f32 %v986_v48, %v3805_v47 }
 0x1c8   : > { %v990_v57 = vsub.f32 %v987_v51, %v989_v53 }
 0x1c9   : > { %v991_v62 = vsub.f32 %v988_v52, %v989_v53 }
 0x1ea   : > { %v1066_v55 = vpop.f32.mrb[2].mxu1 }
 0x1eb   : > { %v1071_v58 = vadd.f32 %v1066_v55, %v994_v54  ;;  %v1068_v59 = vpop.f32.mrb[3].mxu1 }
 0x1ec   : > { %v1072_v63 = vadd.f32 %v1068_v59, %v995_v56  ;;  %v584_v56 = vld [vmem:[%s3827_s29 + $0x80] sm:$0xff] }
 0x1ed   : > { %v1073_v0 = vadd.f32 %v1071_v58, %v990_v57  ;;  %v585_v57 = vld [vmem:[%s3827_s29 + $0x88] sm:$0xff] }
 0x1ee   : > { %v1074_v1 = vadd.f32 %v1072_v63, %v991_v62  ;;  %v569_v62 = vld [vmem:[%s3827_s29 + $0x8] sm:$0xff] }
 0x1ef   : > { %v1075_v2 = vadd.f32 %v1073_v0, %v3819_v61  ;;  %v586_v0 = vld [vmem:[%s3827_s29 + $0x90] sm:$0xff] }
 0x1f0   : > { %v1076_v5 = vadd.f32 %v1074_v1, %v3819_v61  ;;  %v587_v1 = vld [vmem:[%s3827_s29 + $0x98] sm:$0xff] }
 0x1f1   : > { %v1077_v7 = vrot.slane %v1075_v2, 4 }
 0x1f2   : > { %v1083_v12 = vrot.slane %v1076_v5, 4 }
 0x1f3   : > { %v1078_v13 = vmax.f32 %v1075_v2, %v1077_v7  ;;  %v3844_v7 = vpack.c.bf16 %v569_v62, %v568_v60  ;;  %v602_v60 = vld [vmem:[%s4339_s3 + $0x8] sm:$0xff]  ;;  %v619_v62 = vld [vmem:[%s4339_s3 + $0x90] sm:$0xff] }
 0x1f4   : > { %v1084_v16 = vmax.f32 %v1076_v5, %v1083_v12  ;;  %v3847_v12 = vpack.c.bf16 %v587_v1, %v586_v0  ;;  %v620_v0 = vld [vmem:[%s4339_s3 + $0x98] sm:$0xff] }
 0x1f5   : > { %v1079_v17 = vrot.slane %v1078_v13, 2 }
 0x1f6   : > { %v1085_v22 = vrot.slane %v1084_v16, 2 }
 0x1f7   : > { %v1080_v24 = vmax.f32 %v1078_v13, %v1079_v17  ;;  %v570_v13 = vld [vmem:[%s3827_s29 + $0x10] sm:$0xff]  ;;  %v588_v17 = vld [vmem:[%s3827_s29 + $0xa0] sm:$0xff] }
 0x1f8   : > { %v1086_v25 = vmax.f32 %v1084_v16, %v1085_v22  ;;  %v571_v16 = vld [vmem:[%s3827_s29 + $0x18] sm:$0xff]  ;;  %v589_v22 = vld [vmem:[%s3827_s29 + $0xa8] sm:$0xff] }
 0x1f9   : > { %v1081_v26 = vrot.slane %v1080_v24, 1 }
 0x1fa   : > { %v1087_v27 = vrot.slane %v1086_v25, 1 }
 0x1fb   : > { %v1082_v31 = vmax.f32 %v1080_v24, %v1081_v26  ;;  %v3858_v24 = vpack.c.bf16 %v571_v16, %v570_v13  ;;  %v572_v26 = vld [vmem:[%s3827_s29 + $0x20] sm:$0xff]  ;;  %v603_v13 = vld [vmem:[%s4339_s3 + $0x10] sm:$0xff]  ;;  %v604_v16 = vld [vmem:[%s4339_s3 + $0x18] sm:$0xff] }
 0x1fc   : > { %v1088_v32 = vmax.f32 %v1086_v25, %v1087_v27  ;;  %v3861_v25 = vpack.c.bf16 %v589_v22, %v588_v17  ;;  %v573_v27 = vld [vmem:[%s3827_s29 + $0x28] sm:$0xff]  ;;  %v621_v17 = vld [vmem:[%s4339_s3 + $0xa0] sm:$0xff] }
 0x1fd   : > { %v1089_v33 = vsub.f32 %v1075_v2, %v1082_v31  ;;  %v3839_v2 = vpack.c.bf16 %v585_v57, %v584_v56  ;;  %v590_v31 = vld [vmem:[%s3827_s29 + $0xb0] sm:$0xff]  ;;  %v601_v56 = vld [vmem:[%s4339_s3] sm:$0xff]  ;;  %v622_v22 = vld [vmem:[%s4339_s3 + $0xa8] sm:$0xff] }
 0x1fe   : > { %v1090_v34 = vsub.f32 %v1076_v5, %v1088_v32  ;;  %v591_v32 = vld [vmem:[%s3827_s29 + $0xb8] sm:$0xff]  ;;  %v3917_v1 = vpack.c.bf16 %v602_v60, %v601_v56  ;;  %v607_v56 = vld [vmem:[%s4339_s3 + $0x30] sm:$0xff] }
 0x1ff   : > { %v1091_v35 = vmul.f32 1.442695, %v1089_v33  ;;  %v3868_v33 = vpack.c.bf16 %v573_v27, %v572_v26  ;;  %v580_v27 = vld [vmem:[%s3827_s29 + $0x60] sm:$0xff]  ;;  %v608_v60 = vld [vmem:[%s4339_s3 + $0x38] sm:$0xff] }
 0x200   : > { %v1093_v36 = vmul.f32 1.442695, %v1090_v34  ;;  %v3871_v34 = vpack.c.bf16 %v591_v32, %v590_v31  ;;  %v581_v31 = vld [vmem:[%s3827_s29 + $0x68] sm:$0xff]  ;;  %v3940_v32 = vpack.c.bf16 %v604_v16, %v603_v13  ;;  %v3992_v16 = vpack.c.bf16 %v608_v60, %v607_v56  ;;  %v613_v60 = vld [vmem:[%s4339_s3 + $0x60] sm:$0xff] }
 0x201   : > { %3509 = vpow2.f32 %v1091_v35  ;;  %v574_v35 = vld [vmem:[%s3827_s29 + $0x30] sm:$0xff] }
 0x202   : > { %3511 = vpow2.f32 %v1093_v36  ;;  %v575_v36 = vld [vmem:[%s3827_s29 + $0x38] sm:$0xff] }
 0x20b   : > { %v3510_v37 = vpop.eup %3509 }
 0x20c   : > { %v3512_v38 = vpop.eup %3511  ;;  %v1095_v40 = vrot.slane %v3510_v37, 4 }
 0x20d   : > { %v1101_v41 = vrot.slane %v3512_v38, 4 }
 0x20e   : > { %v1096_v42 = vadd.f32 %v3510_v37, %v1095_v40  ;;  %v3878_v40 = vpack.c.bf16 %v575_v36, %v574_v35  ;;  %v598_v36 = vld [vmem:[%s3827_s29 + $0xf0] sm:$0xff] }
 0x20f   : > { %v1102_v43 = vadd.f32 %v3512_v38, %v1101_v41 }
 0x210   : > { %v1097_v44 = vrot.slane %v1096_v42, 2 }
 0x211   : > { %v1103_v46 = vrot.slane %v1102_v43, 2 }
 0x212   : > { %v1098_v48 = vadd.f32 %v1097_v44, %v1096_v42  ;;  %v576_v42 = vld [vmem:[%s3827_s29 + $0x40] sm:$0xff]  ;;  %v594_v44 = vld [vmem:[%s3827_s29 + $0xd0] sm:$0xff] }
 0x213   : > { %v1104_v49 = vadd.f32 %v1103_v46, %v1102_v43  ;;  %v577_v43 = vld [vmem:[%s3827_s29 + $0x48] sm:$0xff]  ;;  %v595_v46 = vld [vmem:[%s3827_s29 + $0xd8] sm:$0xff] }
 0x214   : > { %v1099_v51 = vrot.slane %v1098_v48, 1  ;;  %v3904_v57 = vpack.c.bf16 %v595_v46, %v594_v44  ;;  %v623_v44 = vld [vmem:[%s4339_s3 + $0xb0] sm:$0xff]  ;;  %v624_v46 = vld [vmem:[%s4339_s3 + $0xb8] sm:$0xff] }
 0x215   : > { %v1105_v52 = vrot.slane %v1104_v49, 1 }
 0x216   : > { %v1100_v53 = vadd.f32 %v1099_v51, %v1098_v48  ;;  %v578_v48 = vld [vmem:[%s3827_s29 + $0x50] sm:$0xff]  ;;  %v3890_v51 = vpack.c.bf16 %v577_v43, %v576_v42  ;;  %v606_v42 = vld [vmem:[%s4339_s3 + $0x28] sm:$0xff]  ;;  %v599_v43 = vld [vmem:[%s3827_s29 + $0xf8] sm:$0xff] }
 0x217   : > { %v1106_v54 = vadd.f32 %v1105_v52, %v1104_v49  ;;  %v579_v49 = vld [vmem:[%s3827_s29 + $0x58] sm:$0xff]  ;;  %v596_v52 = vld [vmem:[%s3827_s29 + $0xe0] sm:$0xff] }
 0x218   : > { %3513 = vrcp.f32 %v1100_v53  ;;  %v597_v53 = vld [vmem:[%s3827_s29 + $0xe8] sm:$0xff]  ;;  %v3935_v26 = vpack.c.bf16 %v579_v49, %v578_v48  ;;  %v3963_v48 = vpack.c.bf16 %v581_v31, %v580_v27  ;;  %v582_v49 = vld [vmem:[%s3827_s29 + $0x70] sm:$0xff] }
 0x219   : > { %3515 = vrcp.f32 %v1106_v54  ;;  %v617_v54 = vld [vmem:[%s4339_s3 + $0x80] sm:$0xff]  ;;  %v3943_v35 = vpack.c.bf16 %v597_v53, %v596_v52  ;;  %v3970_v53 = vpack.c.bf16 %v599_v43, %v598_v36  ;;  %v610_v27 = vld [vmem:[%s4339_s3 + $0x48] sm:$0xff]  ;;  %v627_v31 = vld [vmem:[%s4339_s3 + $0xd0] sm:$0xff] }
 0x21a   : > { %4387 = vst [vmem:[#allocation13_spill] sm:$0xff] %v3963_v48  ;;  %v628_v36 = vld [vmem:[%s4339_s3 + $0xd8] sm:$0xff]  ;;  %v611_v43 = vld [vmem:[%s4339_s3 + $0x50] sm:$0xff] }
 0x21b   : > { %4388 = vst [vmem:[#allocation14_spill] sm:$0xff] %v3970_v53 }
 0x222   : > { %v3514_v55 = vpop.eup %3513 }
 0x223   : > { %v3516_v58 = vpop.eup %3515  ;;  %v3831_v59 = vmul.f32 %v3514_v55, %v3510_v37  ;;  %v592_v37 = vld [vmem:[%s3827_s29 + $0xc0] sm:$0xff]  ;;  %v618_v55 = vld [vmem:[%s4339_s3 + $0x88] sm:$0xff] }
 0x224   : > { %v3835_v63 = vmul.f32 %v3516_v58, %v3512_v38  ;;  %v593_v38 = vld [vmem:[%s3827_s29 + $0xc8] sm:$0xff]  ;;  %v3906_v58 = vpack.c.bf16 %v618_v55, %v617_v54  ;;  %v583_v54 = vld [vmem:[%s3827_s29 + $0x78] sm:$0xff]  ;;  %v3974_v55 = vpack.c.bf16 %v624_v46, %v623_v44  ;;  %s3027_s29 = sshll.u32 %s4420_s21, 4 }
 0x225   : > { %v3881_v41 = vpack.c.bf16 %v593_v38, %v592_v37  ;;  %v3947_v37 = vpack.c.bf16 %v622_v22, %v621_v17  ;;  %v605_v38 = vld [vmem:[%s4339_s3 + $0x20] sm:$0xff]  ;;  %v3989_v13 = vpack.c.bf16 %v583_v54, %v582_v49  ;;  %v612_v44 = vld [vmem:[%s4339_s3 + $0x58] sm:$0xff]  ;;  %v630_v54 = vld [vmem:[%s4339_s3 + $0xe8] sm:$0xff]  ;;  %s4172_s17 = scalar_lea.vmem %s4351_s15, %s3027_s29 }
 0x226   : > { %1111 = vmatprep.subr.mxu0 %v3835_v63  ;;  %v1335_v5 = vadd.f32 %v3835_v63, %v3831_v59  ;;  %3309 = vmatprep.subr.bf16.mxu1 %v3906_v58  ;;  %v3967_v52 = vpack.c.bf16 %v606_v42, %v605_v38  ;;  %v609_v22 = vld [vmem:[%s4339_s3 + $0x40] sm:$0xff]  ;;  %v4015_v42 = vpack.c.bf16 %v628_v36, %v627_v31  ;;  %v615_v36 = vld [vmem:[%s4339_s3 + $0x70] sm:$0xff] }
 0x227   : > { %1112 = vmatpush1.msra.mxu0 %v3831_v59  ;;  %3311 = vmatpush3.bf16.msra.mxu1 %v3917_v1  ;;  %4389 = vst [vmem:[#allocation15_spill] sm:$0xff] %v3989_v13  ;;  %v4012_v38 = vpack.c.bf16 %v610_v27, %v609_v22  ;;  %v4026_v46 = vpack.c.bf16 %v612_v44, %v611_v43  ;;  %v629_v49 = vld [vmem:[%s4339_s3 + $0xe0] sm:$0xff]  ;;  %v631_v22 = vld [vmem:[%s4339_s3 + $0xf0] sm:$0xff]  ;;  %v632_v27 = vld [vmem:[%s4339_s3 + $0xf8] sm:$0xff] }
 0x228   : > { %1336 = vadd.xlane.f32.xlu0 %v1335_v5  ;;  %2990 = vmatmul.mubr.msk.f32.vlgmr.msra.gmra.mrb[4].mxu0 %vm996_vm7, %v3795_v15  ;;  %v3919_v5 = vpack.c.bf16 %v620_v0, %v619_v62  ;;  %v625_v62 = vld [vmem:[%s4339_s3 + $0xc0] sm:$0xff]  ;;  %v626_v0 = vld [vmem:[%s4339_s3 + $0xc8] sm:$0xff]  ;;  %v4038_v56 = vpack.c.bf16 %v630_v54, %v629_v49  ;;  %v4056_v31 = vpack.c.bf16 %v632_v27, %v631_v22  ;;  %v616_v43 = vld [vmem:[%s4339_s3 + $0x78] sm:$0xff]  ;;  %v894_v49 = vmul.f32 1.442695, %v3787_v6 }
 0x229   : > { %3341 = vmatprep.subr.bf16.mxu0 %v3839_v2  ;;  %1329 = vmatprep.mubr.f32.mxu0 %v3835_v63  ;;  %v3996_v17 = vpack.c.bf16 %v626_v0, %v625_v62  ;;  %v614_v62 = vld [vmem:[%s4339_s3 + $0x68] sm:$0xff]  ;;  %v4064_v44 = vpack.c.bf16 %v616_v43, %v615_v36  ;;  %v896_v54 = vmul.f32 1.442695, %v3789_v11  ;;  %v4076_v6 = vld [vmem:[%s4344_s8] sm:$0x7]  ;;  %v4390_v11 = vmov 0.0|0.0  }
 0x22a   : > { %3343 = vmatpush3.bf16.msra.mxu0 %v3844_v7  ;;  %3313 = vmatprep.subr.bf16.mxu1 %v3919_v5  ;;  %v4046_v0 = vpack.c.bf16 %v614_v62, %v613_v60  ;;  %3517 = vpow2.f32 %v894_v49 }
 0x22b   : > { %3345 = vmatprep.subr.bf16.mxu0 %v3847_v12  ;;  %3315 = vmatpush3.bf16.msra.mxu1 %v3940_v32  ;;  %3519 = vpow2.f32 %v896_v54 }
 0x22c   : > { %3317 = vmatprep.subr.bf16.mxu1 %v3947_v37 }
 0x22e   : > { %3347 = vmatpush3.bf16.msra.mxu0 %v3858_v24 }
 0x22f   : > { %3349 = vmatprep.subr.bf16.mxu0 %v3861_v25  ;;  %3319 = vmatpush3.bf16.msra.mxu1 %v3967_v52 }
 0x230   : > { %3321 = vmatprep.subr.bf16.mxu1 %v3974_v55 }
 0x232   : > { %3351 = vmatpush3.bf16.msra.mxu0 %v3868_v33 }
 0x233   : > { %3353 = vmatprep.subr.bf16.mxu0 %v3871_v34  ;;  %3323 = vmatpush3.bf16.msra.mxu1 %v3992_v16 }
 0x234   : > { %3325 = vmatprep.subr.bf16.mxu1 %v3996_v17  ;;  %v3518_v27 = vpop.eup %3517 }
 0x236   : > { %3355 = vmatpush3.bf16.msra.mxu0 %v3878_v40 }
 0x237   : > { %3357 = vmatprep.subr.bf16.mxu0 %v3881_v41  ;;  %3327 = vmatpush3.bf16.msra.mxu1 %v4012_v38 }
 0x238   : > { %3329 = vmatprep.subr.bf16.mxu1 %v4015_v42 }
 0x23a   : > { %3359 = vmatpush3.bf16.msra.mxu0 %v3890_v51 }
 0x23b   : > { %3361 = vmatprep.subr.bf16.mxu0 %v3904_v57  ;;  %3331 = vmatpush3.bf16.msra.mxu1 %v4026_v46 }
 0x23c   : > { %3333 = vmatprep.subr.bf16.mxu1 %v4038_v56 }
 0x23e   : > { %3363 = vmatpush3.bf16.msra.mxu0 %v3935_v26 }
 0x23f   : > { %3365 = vmatprep.subr.bf16.mxu0 %v3943_v35  ;;  %3335 = vmatpush3.bf16.msra.mxu1 %v4046_v0 }
 0x240   : > { %3337 = vmatprep.subr.bf16.mxu1 %v4056_v31 }
 0x242   : > { %3367 = vmatpush3.bf16.msra.mxu0 %v3963_v48 }
 0x243   : > { %3369 = vmatprep.subr.bf16.mxu0 %v3970_v53  ;;  %3339 = vmatpush3.bf16.msra.mxu1 %v4064_v44 }
 0x244   : > { %3218 = vmatprep.subr.mxu1 %v4357_v8 }
 0x246   : > { %3371 = vmatpush3.bf16.msra.mxu0 %v3989_v13  ;;  %v3520_v13 = vpop.eup %3519 }
 0x247   : > { %3372 = vmatprep.subr.bf16.mxu0 %v4352_v3 }
 0x249   : > { %1330 = vmatmul.mubr.f32.vlgmr.msra.gmra.mrb[6].mxu0 %v3831_v59 }
 0x24a   : > { %3231 = vmatprep.mubr.msk.f32.mxu0 %vm3575_vm0, %v4357_v8 }
 0x2fb   : > { %v1177_v60 = vpop.f32.mrb[4].mxu0 }
 0x2fc   : > { %v1182_v62 = vsub.f32 1.0, %v1177_v60  ;;  %v1179_v22 = vpop.f32.mrb[5].mxu0 }
 0x2fd   : > { %v1183_v3 = vsub.f32 1.0, %v1179_v22  ;;  %v653_v22 = vld [vmem:[%s4345_s9 + $0x8] sm:$0xff] }
 0x2fe   : > { %v1184_v36 = vmul.f32 %v3518_v27, %v1182_v62  ;;  %v652_v62 = vld [vmem:[%s4345_s9] sm:$0xff] }
 0x2ff   : > { %v1185_v43 = vmul.f32 %v3520_v13, %v1183_v3  ;;  %v1337_v3 = vpop.xlane.xlu0 %1336  ;;  %v4101_v27 = vpack.c.bf16 %v653_v22, %v652_v62 }
 0x300   : > { %v1186_v48 = vsub.f32 %v3831_v59, %v1184_v36  ;;  %v1338_v59 = vmul.f32 %v1337_v3, %v3779_v39  ;;  %v649_v36 = vld [vmem:[%s4343_s7 + $0x10] sm:$0xff] }
 0x301   : > { %v1187_v53 = vsub.f32 %v3835_v63, %v1185_v43  ;;  %4391 = vst [vmem:[#allocation16_spill] sm:$0xff] %v4101_v27  ;;  %v650_v43 = vld [vmem:[%s4343_s7 + $0x18] sm:$0xff] }
 0x302   : > { %v4112_v3 = vpack.c.bf16 %v650_v43, %v649_v36 }
 0x303   : > { %1258 = vmatprep.mubr.f32.mxu1 %v1187_v53  ;;  %v648_v53 = vld [vmem:[%s4343_s7 + $0x8] sm:$0xff] }
 0x304   : > { %1259 = vmatmul.mubr.f32.vlgmr.msra.gmra.mrb[4].mxu1 %v1186_v48  ;;  %v647_v48 = vld [vmem:[%s4343_s7] sm:$0xff] }
 0x305   : > { %3219 = vmatpush3.msk.msra.mxu1 %vm674_vm1, %v4076_v6  ;;  %3220 = vmatprep.mubr.msk.f32.mxu1 %vm3575_vm0, %v4357_v8  ;;  %v4093_v60 = vpack.c.bf16 %v648_v53, %v647_v48  ;;  %v4136_v48 = vld [vmem:[%s4340_s4] ss:$0 sm:$0xff] }
 0x306   : > { %3378 = vmatprep.subr.bf16.mxu1 %v4390_v11  ;;  %4393 = vst [vmem:[#allocation18_spill] sm:$0xff] %v4136_v48 }
 0x307   : > { %3374 = vmatpush3.bf16.msra.mxu0 %v4093_v60 }
 0x308   : > { %3375 = vmatprep.subr.bf16.mxu0 %v4390_v11 }
 0x30b   : > { %3377 = vmatpush3.bf16.msra.mxu0 %v4112_v3 }
 0x30c   : > { %3385 = vmatprep.subr.bf16.mxu0 %v3679_v4 }
 0x31c   : > { %v3100_v13 = vpop.f32.mrb[6].mxu0 }
 0x31d   : > { %v3101_v63 = vpop.f32.mrb[7].mxu0 }
 0x31e   : > { %v3102_v49 = vadd.f32 %v3101_v63, %v3100_v13  ;;  %v654_v13 = vld [vmem:[%s4345_s9 + $0x10] sm:$0xff]  ;;  %v655_v63 = vld [vmem:[%s4345_s9 + $0x18] sm:$0xff] }
 0x320   : > { %v1339_v54 = vsub.f32 %v3102_v49, %v1338_v59  ;;  %v4121_v59 = vpack.c.bf16 %v655_v63, %v654_v13 }
 0x322   : > { %3221 = vmatmul.mubr.msk.f32.vlgmr.msra.gmra.mrb[6].mxu1 %vm902_vm3, %v1339_v54  ;;  %4392 = vst [vmem:[#allocation17_spill] sm:$0xff] %v4121_v59 }
 0x323   : > { %3242 = vmatprep.mubr.msk.f32.mxu1 %vm3575_vm0, %v4357_v8  ;;  %3380 = vmatpush3.bf16.msra.mxu1 %v4101_v27 }
 0x324   : > { %3381 = vmatprep.subr.bf16.mxu1 %v4390_v11 }
 0x327   : > { %3383 = vmatpush3.bf16.msra.mxu1 %v4121_v59 }
 0x328   : > { %3392 = vmatprep.subr.bf16.mxu1 %v4390_v11 }
 0x32a   : > { %3243 = vmatmul.mubr.f32.vlgmr.msra.gmra.mrb[8].mxu1 %v4357_v8 }
 0x32b   : > { %3394 = vmatpush3.bf16.msra.mxu1 %v3692_v9  ;;  %3253 = vmatprep.mubr.msk.f32.mxu1 %vm3575_vm0, %v4357_v8 }
 0x32c   : > { %3395 = vmatprep.subr.bf16.mxu1 %v4390_v11 }
 0x32f   : > { %3397 = vmatpush3.bf16.msra.mxu1 %v3720_v18 }
 0x3d7   : > { %v3065_v49 = vpop.f32.mrb[4].mxu1 }
 0x3d8   : > { %v3066_v53 = vpop.f32.mrb[5].mxu1 }
 0x3d9   : > { %v3067_v62 = vadd.f32 %v3066_v53, %v3065_v49 }
 0x3db   : > { %v1261_v22 = vadd.f32 %v3067_v62, %v4136_v48 }
 0x3dd   : > { %v1264_v36 = vmax.f32 %v1261_v22, 0.0 }
 0x3df   : > { %3232 = vmatmul.mubr.msk.f32.vlgmr.msra.gmra.mrb[8].mxu0 %vm719_vm9, %v1264_v36  ;;  %v4149_v36 = vld [vmem:[%s4346_s10] ss:$0 sm:$0xff] }
 0x3e0   : > { %3387 = vmatpush1.bf16.msra.mxu0 %v3694_v10  ;;  %1635 = vmatprep.mubr.f32.mxu0 %v4357_v8  ;;  %4394 = vst [vmem:[#allocation19_spill] sm:$0xff] %v4149_v36 }
 0x3e1   : > { %3389 = vmatprep.subr.bf16.mxu0 %v3707_v14 }
 0x3e4   : > { %3391 = vmatpush1.bf16.msra.mxu0 %v3722_v19 }
 0x3e5   : > { %2998 = vmatprep.subr.msk.mxu0 %vm674_vm1, %v3749_v21 }
 0x3f5   : > { %v1412_v43 = vpop.f32.mrb[6].mxu1 }
 0x3f6   : > { %v3222_v13 = vpop.f32.mrb[7].mxu1 }
 0x3f7   : > { %v4162_v13 = vstv %s702_s28  ;;  %s4242_s28 = scalar_lea.vmem %s4348_s12, %s4193_s18 }
 0x3f8   : > { %4397 = vst [vmem:[#allocation21_spill] sm:$0xff] %v4162_v13 }
 0x3fd   : > { %v1555_v63 = vpop.f32.mrb[8].mxu1 }
 0x3fe   : > { %v3244_v49 = vpop.f32.mrb[9].mxu1 }
 0x4b2   : > { %v1485_v53 = vpop.f32.mrb[8].mxu0 }
 0x4b3   : > { %v1486_v62 = vadd.f32 %v1485_v53, %v1412_v43  ;;  %v3233_v22 = vpop.f32.mrb[9].mxu0  ;;  %v4396_v43 = vmov 0.0  }
 0x4b5   : > { %v1559_v8 = vadd.f32 %v1555_v63, %v1486_v62 }
 0x4b7   : > { %v1566_v14 = vadd.f32 %v4149_v36, %v1559_v8  ;;  %v1747_v8 = vmul.f32 %v4162_v13, %v1339_v54 }
 0x4b9   : > { %3521 = vtanh.f32 %v1566_v14  ;;  %v1748_v49 = vadd.f32 %v1747_v8, %v3779_v39 }
 0x4c3   : > { %v4152_v19 = vpop.eup %3521 }
 0x4c4   : > { %4395 = vst [vmem:[#allocation20_spill] sm:$0xff] %v4152_v19  ;;  %2996 = vmatmul.mubr.msk.f32.vlgmr.msra.gmra.mrb[10].mxu0 %vm719_vm9, %v4152_v19  ;;  %3254 = vmatmul.mubr.msk.f32.vlgmr.msra.gmra.mrb[10].mxu1 %vm719_vm9, %v4152_v19 }
 0x4c5   : > { %2999 = vmatpush1.msk.msra.mxu0 %vm674_vm1, %v3745_v20  ;;  %1817 = vmatprep.mubr.f32.mxu0 %v4396_v43 }
 0x4c6   : > { %1903 = vmatprep.mubr.f32.mxu1 %v4396_v43 }
 0x597   : > { %v1637_v14 = vpop.f32.mrb[10].mxu0  ;;  %v1708_v63 = vpop.f32.mrb[10].mxu1 }
 0x598   : > { %v1638_v53 = vadd.f32 %v1637_v14, %v3769_v29  ;;  %v1709_v62 = vadd.f32 %v1708_v63, %v3767_v28  ;;  %v1639_v20 = vpop.f32.mrb[11].mxu0  ;;  %v3255_v22 = vpop.f32.mrb[11].mxu1 }
 0x599   : > { %v1640_v36 = vadd.f32 %v1639_v20, %v3771_v30 }
 0x59a   : > { %v1714_v54 = vand.u32 2147483647, %v1638_v53  ;;  %v4177_v13 = vsel %vm660_vm2, %v1709_v62, %v1748_v49 }
 0x59b   : > { %4398 = vst [vmem:[#allocation22_spill] sm:$0xff] %v4177_v13  ;;  %v1715_v39 = vand.u32 2147483647, %v1640_v36  ;;  %3000 = vmatmul.mubr.msk.f32.vlgmr.msra.gmra.mrb[12].mxu0 %vm902_vm3, %v4177_v13  ;;  %v1824_v8 = vmul.f32 %v4177_v13, %v4177_v13  ;;  %1956 = vst.msk [vmem:[%s4172_s17] sm:$0xff] %vm902_vm3, %v4177_v13  ;;  %v1713_v19 = vmin.f32 %v1640_v36, 0.0 }
 0x59c   : > { %v1716_v14 = vsub.f32 0.0, %v1714_v54  ;;  %2021 = vmatprep.mubr.f32.mxu0 %v4396_v43 }
 0x59d   : > { %v1717_v63 = vsub.f32 0.0, %v1715_v39  ;;  %v1825_v20 = vsel %vm902_vm3, %v1824_v8, 0.0 }
 0x59e   : > { %v1718_v22 = vmul.f32 1.442695, %v1716_v14  ;;  %1826 = vadd.xlane.f32.xlu1 %v1825_v20  ;;  %v1712_v20 = vmin.f32 %v1638_v53, 0.0 }
 0x59f   : > { %v1720_v49 = vmul.f32 1.442695, %v1717_v63 }
 0x5a0   : > { %3523 = vpow2.f32 %v1718_v22 }
 0x5a1   : > { %3525 = vpow2.f32 %v1720_v49 }
 0x5aa   : > { %v3524_v62 = vpop.eup %3523 }
 0x5ab   : > { %v3526_v23 = vpop.eup %3525  ;;  %v1722_v30 = vadd.f32 1.0, %v3524_v62  ;;  %v1725_v29 = vmul.f32 -0.5, %v3524_v62  ;;  %v1728_v54 = vand.u32 2147483647, %v3524_v62 }
 0x5ac   : > { %v1731_v28 = vadd.f32 1.0, %v3526_v23  ;;  %v1734_v21 = vmul.f32 -0.5, %v3526_v23  ;;  %v1737_v18 = vand.u32 2147483647, %v3526_v23 }
 0x5ad   : > { %3527 = vlog2.f32 %v1722_v30  ;;  %v1726_v10 = vadd.f32 1.0, %v1725_v29  ;;  %vm1729_vm10 = vcmp.lt.f32.partialorder %v1728_v54, 0.0004427343 }
 0x5ae   : > { %3529 = vlog2.f32 %v1731_v28  ;;  %v1735_v48 = vadd.f32 1.0, %v1734_v21  ;;  %vm1738_vm11 = vcmp.lt.f32.partialorder %v1737_v18, 0.0004427343 }
 0x5af   : > { %v1727_v14 = vmul.f32 %v3524_v62, %v1726_v10 }
 0x5b0   : > { %v1736_v22 = vmul.f32 %v3526_v23, %v1735_v48 }
 0x5b7   : > { %v3528_v39 = vpop.eup %3527 }
 0x5b8   : > { %v3530_v9 = vpop.eup %3529  ;;  %v1724_v8 = vmul.f32 0.6931472, %v3528_v39 }
 0x5b9   : > { %v1733_v63 = vmul.f32 0.6931472, %v3530_v9 }
 0x5ba   : > { %v1730_v49 = vsel %vm1729_vm10, %v1727_v14, %v1724_v8 }
 0x5bb   : > { %v1740_v30 = vsub.f32 %v1712_v20, %v1730_v49  ;;  %v1739_v28 = vsel %vm1738_vm11, %v1736_v22, %v1733_v63 }
 0x5bc   : > { %v1741_v59 = vsub.f32 %v1713_v19, %v1739_v28 }
 0x5bd   : > { %v1742_v27 = vmul.f32 1.442695, %v1740_v30  ;;  %v1835_v21 = vsub.f32 %v1740_v30, %v1638_v53 }
 0x5be   : > { %v1744_v29 = vmul.f32 1.442695, %v1741_v59  ;;  %v1836_v13 = vsub.f32 %v1741_v59, %v1640_v36 }
 0x5bf   : > { %3531 = vpow2.f32 %v1742_v27 }
 0x5c0   : > { %3533 = vpow2.f32 %v1744_v29  ;;  %1839 = vmatprep.subr.mxu1 %v1836_v13 }
 0x5c1   : > { %1840 = vmatpush1.msra.mxu1 %v1835_v21 }
 0x5c2   : > { %3001 = vmatmul.mubr.msk.f32.vlgmr.msra.gmra.mrb[12].mxu1 %vm996_vm7, %v3795_v15  ;;  %3399 = vmatprep.subr.bf16.mxu1 %v3906_v58 }
 0x5c3   : > { %3401 = vmatpush3.bf16.msra.mxu1 %v3917_v1 }
 0x5c4   : > { %3403 = vmatprep.subr.bf16.mxu1 %v3919_v5 }
 0x5c7   : > { %3405 = vmatpush3.bf16.msra.mxu1 %v3940_v32 }
 0x5c8   : > { %3407 = vmatprep.subr.bf16.mxu1 %v3947_v37 }
 0x5c9   : > { %v4204_v9 = vpop.eup %3531 }
 0x5ca   : > { %v4206_v10 = vpop.eup %3533  ;;  %1954 = vst [vmem:[%s4200_s11] sm:$0xff] %v4204_v9 }
 0x5cb   : > { %1955 = vst [vmem:[%s4200_s11 + $0x8] sm:$0xff] %v4206_v10  ;;  %3409 = vmatpush3.bf16.msra.mxu1 %v3967_v52  ;;  %v1837_v52 = vmul.f32 %v3810_v50, %v1740_v30 }
 0x5cc   : > { %3411 = vmatprep.subr.bf16.mxu1 %v3974_v55 }
 0x5cf   : > { %3413 = vmatpush3.bf16.msra.mxu1 %v3992_v16  ;;  %v1838_v16 = vmul.f32 %v3810_v50, %v1741_v59 }
 0x5d0   : > { %3415 = vmatprep.subr.bf16.mxu1 %v3996_v17 }
 0x5d3   : > { %3417 = vmatpush3.bf16.msra.mxu1 %v4012_v38 }
 0x5d4   : > { %3419 = vmatprep.subr.bf16.mxu1 %v4015_v42 }
 0x5d7   : > { %3421 = vmatpush3.bf16.msra.mxu1 %v4026_v46 }
 0x5d8   : > { %3423 = vmatprep.subr.bf16.mxu1 %v4038_v56 }
 0x5db   : > { %3425 = vmatpush3.bf16.msra.mxu1 %v4046_v0 }
 0x5dc   : > { %3427 = vmatprep.subr.bf16.mxu1 %v4056_v31 }
 0x5df   : > { %3429 = vmatpush3.bf16.msra.mxu1 %v4064_v44 }
 0x5e0   : > { %3256 = vmatprep.subr.mxu1 %v4396_v43 }
 0x62b   : > { %v1827_v1 = vpop.xlane.xlu1 %1826 }
 0x62c   : > { %v1832_v37 = vmul.f32 12.5, %v1827_v1 }
 0x66e   : > { %v1819_v18 = vpop.f32.mrb[12].mxu0 }
 0x66f   : > { %v1821_v19 = vpop.f32.mrb[13].mxu0  ;;  %v1828_v23 = vmul.f32 25.0, %v1819_v18 }
 0x670   : > { %v1829_v58 = vmul.f32 25.0, %v1821_v19 }
 0x671   : > { %v1830_v5 = vadd.f32 %v1828_v23, %v3803_v45 }
 0x672   : > { %v1831_v32 = vadd.f32 %v1829_v58, %v3805_v47 }
 0x673   : > { %v1833_v17 = vsub.f32 %v1830_v5, %v1832_v37 }
 0x674   : > { %v1834_v46 = vsub.f32 %v1831_v32, %v1832_v37 }
 0x695   : > { %v1905_v55 = vpop.f32.mrb[12].mxu1 }
 0x696   : > { %v1910_v38 = vadd.f32 %v1905_v55, %v1837_v52  ;;  %v1907_v42 = vpop.f32.mrb[13].mxu1 }
 0x697   : > { %v1911_v56 = vadd.f32 %v1907_v42, %v1838_v16 }
 0x698   : > { %v1912_v0 = vadd.f32 %v1910_v38, %v1833_v17 }
 0x699   : > { %v1913_v31 = vadd.f32 %v1911_v56, %v1834_v46 }
 0x69a   : > { %v1914_v44 = vadd.f32 %v1912_v0, %v3819_v61 }
 0x69b   : > { %v1915_v27 = vadd.f32 %v1913_v31, %v3819_v61 }
 0x69c   : > { %v1916_v48 = vrot.slane %v1914_v44, 4  ;;  %1952 = vst [vmem:[%s4232_s25] sm:$0xff] %v1914_v44 }
 0x69d   : > { %v1922_v59 = vrot.slane %v1915_v27, 4  ;;  %1953 = vst [vmem:[%s4232_s25 + $0x8] sm:$0xff] %v1915_v27 }
 0x69e   : > { %v1917_v36 = vmax.f32 %v1914_v44, %v1916_v48  ;;  %v4407_v48 = vld [vmem:[#allocation6_spill] sm:$0xff] }
 0x69f   : > { %v1923_v13 = vmax.f32 %v1915_v27, %v1922_v59 }
 0x6a0   : > { %v1918_v53 = vrot.slane %v1917_v36, 2 }
 0x6a1   : > { %v1924_v62 = vrot.slane %v1923_v13, 2 }
 0x6a2   : > { %v1919_v54 = vmax.f32 %v1917_v36, %v1918_v53  ;;  %v4408_v53 = vld [vmem:[#allocation18_spill] sm:$0xff] }
 0x6a3   : > { %v1925_v39 = vmax.f32 %v1923_v13, %v1924_v62 }
 0x6a4   : > { %v1920_v8 = vrot.slane %v1919_v54, 1 }
 0x6a5   : > { %v1926_v14 = vrot.slane %v1925_v39, 1 }
 0x6a6   : > { %v1921_v20 = vmax.f32 %v1919_v54, %v1920_v8  ;;  %v4410_v8 = vld [vmem:[#allocation5_spill] sm:$0xff] }
 0x6a7   : > { %v1927_v63 = vmax.f32 %v1925_v39, %v1926_v14  ;;  %v4409_v39 = vld [vmem:[#allocation4_spill] sm:$0xff]  ;;  %v4411_v14 = vld [vmem:[#allocation7_spill] sm:$0xff] }
 0x6a8   : > { %v1928_v22 = vsub.f32 %v1914_v44, %v1921_v20  ;;  %v4405_v44 = vld [vmem:[#allocation20_spill] sm:$0xff] }
 0x6a9   : > { %v1929_v49 = vsub.f32 %v1915_v27, %v1927_v63  ;;  %v4406_v27 = vld [vmem:[#allocation3_spill] sm:$0xff] }
 0x6aa   : > { %v1930_v30 = vmul.f32 1.442695, %v1928_v22 }
 0x6ab   : > { %v1932_v28 = vmul.f32 1.442695, %v1929_v49 }
 0x6ac   : > { %3535 = vpow2.f32 %v1930_v30 }
 0x6ad   : > { %3537 = vpow2.f32 %v1932_v28 }
 0x6b6   : > { %v3536_v29 = vpop.eup %3535 }
 0x6b7   : > { %v3538_v21 = vpop.eup %3537  ;;  %v1934_v18 = vrot.slane %v3536_v29, 4 }
 0x6b8   : > { %v1940_v19 = vrot.slane %v3538_v21, 4 }
 0x6b9   : > { %v1935_v23 = vadd.f32 %v3536_v29, %v1934_v18  ;;  %v4413_v18 = vld [vmem:[#allocation19_spill] sm:$0xff] }
 0x6ba   : > { %v1941_v58 = vadd.f32 %v3538_v21, %v1940_v19 }
 0x6bb   : > { %v1936_v1 = vrot.slane %v1935_v23, 2 }
 0x6bc   : > { %v1942_v5 = vrot.slane %v1941_v58, 2 }
 0x6bd   : > { %v1937_v32 = vadd.f32 %v1936_v1, %v1935_v23  ;;  %v4414_v1 = vld [vmem:[#allocation21_spill] sm:$0xff] }
 0x6be   : > { %v1943_v37 = vadd.f32 %v1942_v5, %v1941_v58  ;;  %v3565_v58 = vld [vmem:[%s3742_s19] sm:$0x77] }
 0x6bf   : > { %v1938_v52 = vrot.slane %v1937_v32, 1 }
 0x6c0   : > { %v1944_v55 = vrot.slane %v1943_v37, 1 }
 0x6c1   : > { %v1939_v16 = vadd.f32 %v1938_v52, %v1937_v32 }
 0x6c2   : > { %v1945_v17 = vadd.f32 %v1944_v55, %v1943_v37  ;;  %v4415_v55 = vld [vmem:[#allocation11_spill] sm:$0xff] }
 0x6c3   : > { %3539 = vrcp.f32 %v1939_v16 }
 0x6c4   : > { %3541 = vrcp.f32 %v1945_v17  ;;  %v4416_v17 = vld [vmem:[#allocation10_spill] sm:$0xff] }
 0x6cd   : > { %v3540_v38 = vpop.eup %3539 }
 0x6ce   : > { %v3542_v42 = vpop.eup %3541  ;;  %v1947_v46 = vmul.f32 %v3540_v38, %v3536_v29 }
 0x6cf   : > { %v1949_v56 = vmul.f32 %v3542_v42, %v3538_v21 }
 0x6d0   : > { %1950 = vst [vmem:[%s4242_s28] sm:$0xff] %v1947_v46 }
 0x6d1   : > { %1951 = vst [vmem:[%s4242_s28 + $0x8] sm:$0xff] %v1949_v56  ;;  %1957 = vmatprep.subr.mxu0 %v1949_v56  ;;  %v2175_v0 = vadd.f32 %v1949_v56, %v1947_v46 }
 0x6d2   : > { %1958 = vmatpush1.msra.mxu0 %v1947_v46 }
 0x6d3   : > { %2176 = vadd.xlane.f32.xlu1 %v2175_v0  ;;  %3002 = vmatmul.mubr.msk.f32.vlgmr.msra.gmra.mrb[14].mxu0 %vm996_vm7, %v3795_v15 }
 0x6d4   : > { %3431 = vmatprep.subr.bf16.mxu0 %v3839_v2  ;;  %2169 = vmatprep.mubr.f32.mxu0 %v1949_v56  ;;  %v4399_v2 = vld [vmem:[#allocation13_spill] sm:$0xff] }
 0x6d5   : > { %3433 = vmatpush3.bf16.msra.mxu0 %v3844_v7  ;;  %v4400_v7 = vld [vmem:[#allocation14_spill] sm:$0xff] }
 0x6d6   : > { %3435 = vmatprep.subr.bf16.mxu0 %v3847_v12  ;;  %v4401_v12 = vld [vmem:[#allocation15_spill] sm:$0xff] }
 0x6d9   : > { %3437 = vmatpush3.bf16.msra.mxu0 %v3858_v24 }
 0x6da   : > { %3439 = vmatprep.subr.bf16.mxu0 %v3861_v25 }
 0x6dd   : > { %3441 = vmatpush3.bf16.msra.mxu0 %v3868_v33 }
 0x6de   : > { %3443 = vmatprep.subr.bf16.mxu0 %v3871_v34 }
 0x6e1   : > { %3445 = vmatpush3.bf16.msra.mxu0 %v3878_v40 }
 0x6e2   : > { %3447 = vmatprep.subr.bf16.mxu0 %v3881_v41 }
 0x6e5   : > { %3449 = vmatpush3.bf16.msra.mxu0 %v3890_v51 }
 0x6e6   : > { %3451 = vmatprep.subr.bf16.mxu0 %v3904_v57 }
 0x6e9   : > { %3453 = vmatpush3.bf16.msra.mxu0 %v3935_v26 }
 0x6ea   : > { %3455 = vmatprep.subr.bf16.mxu0 %v3943_v35 }
 0x6ed   : > { %3457 = vmatpush3.bf16.msra.mxu0 %v4399_v2 }
 0x6ee   : > { %3459 = vmatprep.subr.bf16.mxu0 %v4400_v7 }
 0x6f1   : > { %3461 = vmatpush3.bf16.msra.mxu0 %v4401_v12 }
 0x6f2   : > { %3462 = vmatprep.subr.bf16.mxu0 %v4390_v11 }
 0x6f4   : > { %2170 = vmatmul.mubr.f32.vlgmr.msra.gmra.mrb[16].mxu0 %v1947_v46 }
 0x6f5   : > { %3464 = vmatpush3.bf16.msra.mxu0 %v4093_v60  ;;  %3269 = vmatprep.mubr.msk.f32.mxu0 %vm3575_vm0, %v4396_v43  ;;  %v4402_v60 = vld [vmem:[#allocation22_spill] sm:$0xff] }
 0x6f6   : > { %3465 = vmatprep.subr.bf16.mxu0 %v4390_v11 }
 0x6f9   : > { %3467 = vmatpush3.bf16.msra.mxu0 %v4112_v3 }
 0x6fa   : > { %3475 = vmatprep.subr.bf16.mxu0 %v3679_v4 }
 0x760   : > { %v2177_v4 = vpop.xlane.xlu1 %2176 }
 0x761   : > { %v2178_v3 = vmul.f32 %v2177_v4, %v4402_v60 }
 0x7a6   : > { %v2023_v24 = vpop.f32.mrb[14].mxu0 }
 0x7a7   : > { %v2028_v25 = vsub.f32 1.0, %v2023_v24  ;;  %v2025_v33 = vpop.f32.mrb[15].mxu0 }
 0x7a8   : > { %v2029_v34 = vsub.f32 1.0, %v2025_v33 }
 0x7a9   : > { %v2030_v40 = vmul.f32 %v4204_v9, %v2028_v25 }
 0x7aa   : > { %v2031_v41 = vmul.f32 %v4206_v10, %v2029_v34  ;;  %v4403_v10 = vld [vmem:[#allocation16_spill] sm:$0xff] }
 0x7ab   : > { %v2032_v57 = vsub.f32 %v1947_v46, %v2030_v40 }
 0x7ac   : > { %v2033_v51 = vsub.f32 %v1949_v56, %v2031_v41  ;;  %v4417_v56 = vld [vmem:[#allocation12_spill] sm:$0xff] }
 0x7ae   : > { %2098 = vmatprep.mubr.f32.mxu1 %v2033_v51 }
 0x7af   : > { %2099 = vmatmul.mubr.f32.vlgmr.msra.gmra.mrb[14].mxu1 %v2032_v57 }
 0x7b0   : > { %3257 = vmatpush3.msk.msra.mxu1 %vm674_vm1, %v4076_v6  ;;  %3258 = vmatprep.mubr.msk.f32.mxu1 %vm3575_vm0, %v4396_v43  ;;  %v4404_v6 = vld [vmem:[#allocation17_spill] sm:$0xff] }
 0x7b1   : > { %3468 = vmatprep.subr.bf16.mxu1 %v4390_v11 }
 0x7c7   : > { %v3187_v26 = vpop.f32.mrb[16].mxu0 }
 0x7c8   : > { %v3188_v35 = vpop.f32.mrb[17].mxu0 }
 0x7c9   : > { %v3189_v9 = vadd.f32 %v3188_v35, %v3187_v26 }
 0x7cb   : > { %v2179_v31 = vsub.f32 %v3189_v9, %v2178_v3 }
 0x7cd   : > { %3259 = vmatmul.mubr.msk.f32.vlgmr.msra.gmra.mrb[16].mxu1 %vm902_vm3, %v2179_v31  ;;  %v2577_v5 = vmul.f32 %v2179_v31, %v4414_v1 }
 0x7ce   : > { %3470 = vmatpush3.bf16.msra.mxu1 %v4403_v10  ;;  %3280 = vmatprep.mubr.msk.f32.mxu1 %vm3575_vm0, %v4396_v43 }
 0x7cf   : > { %3471 = vmatprep.subr.bf16.mxu1 %v4390_v11  ;;  %v2578_v52 = vadd.f32 %v2577_v5, %v4402_v60 }
 0x7d2   : > { %3473 = vmatpush3.bf16.msra.mxu1 %v4404_v6 }
 0x7d3   : > { %3482 = vmatprep.subr.bf16.mxu1 %v4390_v11 }
 0x7d5   : > { %3281 = vmatmul.mubr.msk.f32.vlgmr.msra.gmra.mrb[18].mxu1 %vm719_vm9, %v4405_v44 }
 0x7d6   : > { %3484 = vmatpush3.bf16.msra.mxu1 %v4406_v27  ;;  %3291 = vmatprep.mubr.msk.f32.mxu1 %vm3575_vm0, %v4396_v43 }
 0x7d7   : > { %3485 = vmatprep.subr.bf16.mxu1 %v4390_v11  ;;  %v4412_v11 = vld [vmem:[#allocation8_spill] sm:$0xff] }
 0x7da   : > { %3487 = vmatpush3.bf16.msra.mxu1 %v4407_v48 }
 0x882   : > { %v3152_v59 = vpop.f32.mrb[14].mxu1 }
 0x883   : > { %v3153_v36 = vpop.f32.mrb[15].mxu1 }
 0x884   : > { %v3154_v13 = vadd.f32 %v3153_v36, %v3152_v59 }
 0x886   : > { %v2101_v62 = vadd.f32 %v3154_v13, %v4408_v53 }
 0x888   : > { %v2104_v54 = vmax.f32 %v2101_v62, 0.0 }
 0x88a   : > { %3270 = vmatmul.mubr.msk.f32.vlgmr.msra.gmra.mrb[18].mxu0 %vm719_vm9, %v2104_v54 }
 0x88b   : > { %3477 = vmatpush1.bf16.msra.mxu0 %v4409_v39  ;;  %2466 = vmatprep.mubr.f32.mxu0 %v4396_v43 }
 0x88c   : > { %3479 = vmatprep.subr.bf16.mxu0 %v4410_v8 }
 0x88f   : > { %3481 = vmatpush1.bf16.msra.mxu0 %v4411_v14 }
 0x890   : > { %3009 = vmatprep.subr.msk.mxu0 %vm674_vm1, %v4412_v11 }
 0x8a0   : > { %v2249_v20 = vpop.f32.mrb[16].mxu1 }
 0x8a1   : > { %v3260_v63 = vpop.f32.mrb[17].mxu1 }
 0x8a8   : > { %v2392_v22 = vpop.f32.mrb[18].mxu1 }
 0x8a9   : > { %v3282_v49 = vpop.f32.mrb[19].mxu1 }
 0x95d   : > { %v2322_v30 = vpop.f32.mrb[18].mxu0 }
 0x95e   : > { %v2323_v28 = vadd.f32 %v2322_v30, %v2249_v20  ;;  %v3271_v29 = vpop.f32.mrb[19].mxu0 }
 0x960   : > { %v2396_v21 = vadd.f32 %v2392_v22, %v2323_v28 }
 0x962   : > { %v2397_v19 = vadd.f32 %v4413_v18, %v2396_v21 }
 0x964   : > { %3543 = vtanh.f32 %v2397_v19 }
 0x96e   : > { %v3544_v23 = vpop.eup %3543 }
 0x96f   : > { %3007 = vmatmul.mubr.msk.f32.vlgmr.msra.gmra.mrb[20].mxu0 %vm719_vm9, %v3544_v23  ;;  %3292 = vmatmul.mubr.msk.f32.vlgmr.msra.gmra.mrb[20].mxu1 %vm719_vm9, %v3544_v23 }
 0x970   : > { %3010 = vmatpush1.msk.msra.mxu0 %vm674_vm1, %v3565_v58  ;;  %2647 = vmatprep.mubr.f32.mxu0 %v4396_v43 }
 0x971   : > { %2733 = vmatprep.mubr.f32.mxu1 %v4396_v43 }
 0xa42   : > { %v2468_v32 = vpop.f32.mrb[20].mxu0  ;;  %v2539_v37 = vpop.f32.mrb[20].mxu1 }
 0xa43   : > { %v2469_v16 = vadd.f32 %v2468_v32, %v4415_v55  ;;  %v2540_v38 = vadd.f32 %v2539_v37, %v4416_v17  ;;  %v2470_v42 = vpop.f32.mrb[21].mxu0  ;;  %v3293_v46 = vpop.f32.mrb[21].mxu1 }
 0xa44   : > { %v2471_v0 = vadd.f32 %v2470_v42, %v4417_v56 }
 0xa45   : > { %v2545_v2 = vand.u32 2147483647, %v2469_v16  ;;  %v2579_v12 = vsel %vm660_vm2, %v2540_v38, %v2578_v52  ;;  %v2543_v59 = vmin.f32 %v2469_v16, 0.0 }
 0xa46   : > { %3019 = vst.msk [vmem:[%s4172_s17 + $0x8] sm:$0xff] %vm902_vm3, %v2579_v12  ;;  %v2546_v43 = vand.u32 2147483647, %v2471_v0  ;;  %3011 = vmatmul.mubr.msk.f32.vlgmr.msra.gmra.mrb[22].mxu0 %vm902_vm3, %v2579_v12  ;;  %v2654_v24 = vmul.f32 %v2579_v12, %v2579_v12  ;;  %v2544_v62 = vmin.f32 %v2471_v0, 0.0 }
 0xa47   : > { %v2547_v25 = vsub.f32 0.0, %v2545_v2 }
 0xa48   : > { %v2548_v33 = vsub.f32 0.0, %v2546_v43  ;;  %v2655_v34 = vsel %vm902_vm3, %v2654_v24, 0.0 }
 0xa49   : > { %v2549_v40 = vmul.f32 1.442695, %v2547_v25  ;;  %2656 = vadd.xlane.f32.xlu0 %v2655_v34 }
 0xa4a   : > { %v2551_v41 = vmul.f32 1.442695, %v2548_v33 }
 0xa4b   : > { %3545 = vpow2.f32 %v2549_v40 }
 0xa4c   : > { %3547 = vpow2.f32 %v2551_v41 }
 0xa55   : > { %v3546_v51 = vpop.eup %3545 }
 0xa56   : > { %v3548_v57 = vpop.eup %3547  ;;  %v2553_v4 = vadd.f32 1.0, %v3546_v51  ;;  %v2556_v35 = vmul.f32 -0.5, %v3546_v51  ;;  %v2559_v9 = vand.u32 2147483647, %v3546_v51 }
 0xa57   : > { %v2562_v26 = vadd.f32 1.0, %v3548_v57  ;;  %v2565_v60 = vmul.f32 -0.5, %v3548_v57  ;;  %v2568_v10 = vand.u32 2147483647, %v3548_v57 }
 0xa58   : > { %3549 = vlog2.f32 %v2553_v4  ;;  %v2557_v3 = vadd.f32 1.0, %v2556_v35  ;;  %vm2560_vm12 = vcmp.lt.f32.partialorder %v2559_v9, 0.0004427343 }
 0xa59   : > { %3551 = vlog2.f32 %v2562_v26  ;;  %v2566_v31 = vadd.f32 1.0, %v2565_v60  ;;  %vm2569_vm13 = vcmp.lt.f32.partialorder %v2568_v10, 0.0004427343 }
 0xa5a   : > { %v2558_v48 = vmul.f32 %v3546_v51, %v2557_v3 }
 0xa5b   : > { %v2567_v13 = vmul.f32 %v3548_v57, %v2566_v31 }
 0xa62   : > { %v3550_v6 = vpop.eup %3549 }
 0xa63   : > { %v3552_v44 = vpop.eup %3551  ;;  %v2555_v27 = vmul.f32 0.6931472, %v3550_v6 }
 0xa64   : > { %v2564_v36 = vmul.f32 0.6931472, %v3552_v44 }
 0xa65   : > { %v2561_v53 = vsel %vm2560_vm12, %v2558_v48, %v2555_v27 }
 0xa66   : > { %v2571_v54 = vsub.f32 %v2543_v59, %v2561_v53  ;;  %v2570_v39 = vsel %vm2569_vm13, %v2567_v13, %v2564_v36 }
 0xa67   : > { %v2572_v8 = vsub.f32 %v2544_v62, %v2570_v39 }
 0xa68   : > { %v2573_v14 = vmul.f32 1.442695, %v2571_v54  ;;  %v2665_v63 = vsub.f32 %v2571_v54, %v2469_v16  ;;  %v2667_v1 = vmul.f32 %v3810_v50, %v2571_v54 }
 0xa69   : > { %v2575_v11 = vmul.f32 1.442695, %v2572_v8  ;;  %v2666_v20 = vsub.f32 %v2572_v8, %v2471_v0 }
 0xa6a   : > { %3553 = vpow2.f32 %v2573_v14 }
 0xa6b   : > { %3555 = vpow2.f32 %v2575_v11  ;;  %2669 = vmatprep.subr.mxu1 %v2666_v20 }
 0xa6c   : > { %2670 = vmatpush1.msra.mxu1 %v2665_v63 }
 0xa6d   : > { %3012 = vmatmul.mubr.msk.f32.vlgmr.msra.gmra.mrb[22].mxu1 %vm996_vm7, %v3795_v15  ;;  %v2668_v15 = vmul.f32 %v3810_v50, %v2572_v8 }
 0xa74   : > { %v3554_v22 = vpop.eup %3553 }
 0xa75   : > { %v3556_v49 = vpop.eup %3555  ;;  %3017 = vst [vmem:[%s4200_s11 + $0x10] sm:$0xff] %v3554_v22 }
 0xa76   : > { %3018 = vst [vmem:[%s4200_s11 + $0x18] sm:$0xff] %v3556_v49 }
 0xad6   : > { %v2657_v18 = vpop.xlane.xlu0 %2656 }
 0xad7   : > { %v2662_v58 = vmul.f32 12.5, %v2657_v18 }
 0xb19   : > { %v2649_v30 = vpop.f32.mrb[22].mxu0 }
 0xb1a   : > { %v2651_v28 = vpop.f32.mrb[23].mxu0  ;;  %v2658_v29 = vmul.f32 25.0, %v2649_v30 }
 0xb1b   : > { %v2659_v21 = vmul.f32 25.0, %v2651_v28 }
 0xb1c   : > { %v2660_v19 = vadd.f32 %v2658_v29, %v3803_v45 }
 0xb1d   : > { %v2661_v23 = vadd.f32 %v2659_v21, %v3805_v47 }
 0xb1e   : > { %v2663_v32 = vsub.f32 %v2660_v19, %v2662_v58 }
 0xb1f   : > { %v2664_v55 = vsub.f32 %v2661_v23, %v2662_v58 }
 0xb40   : > { %v2735_v5 = vpop.f32.mrb[22].mxu1 }
 0xb41   : > { %v2740_v37 = vadd.f32 %v2735_v5, %v2667_v1  ;;  %v2737_v52 = vpop.f32.mrb[23].mxu1 }
 0xb42   : > { %v2741_v16 = vadd.f32 %v2737_v52, %v2668_v15 }
 0xb43   : > { %v2742_v17 = vadd.f32 %v2740_v37, %v2663_v32 }
 0xb44   : > { %v2743_v38 = vadd.f32 %v2741_v16, %v2664_v55 }
 0xb45   : > { %v2744_v42 = vadd.f32 %v2742_v17, %v3819_v61 }
 0xb46   : > { %v2745_v45 = vadd.f32 %v2743_v38, %v3819_v61 }
 0xb47   : > { %v2746_v46 = vrot.slane %v2744_v42, 4  ;;  %3015 = vst [vmem:[%s4232_s25 + $0x10] sm:$0xff] %v2744_v42 }
 0xb48   : > { %v2752_v47 = vrot.slane %v2745_v45, 4  ;;  %3016 = vst [vmem:[%s4232_s25 + $0x18] sm:$0xff] %v2745_v45 }
 0xb49   : > { %v2747_v56 = vmax.f32 %v2744_v42, %v2746_v46 }
 0xb4a   : > { %v2753_v0 = vmax.f32 %v2745_v45, %v2752_v47 }
 0xb4b   : > { %v2748_v2 = vrot.slane %v2747_v56, 2 }
 0xb4c   : > { %v2754_v7 = vrot.slane %v2753_v0, 2 }
 0xb4d   : > { %v2749_v50 = vmax.f32 %v2747_v56, %v2748_v2 }
 0xb4e   : > { %v2755_v12 = vmax.f32 %v2753_v0, %v2754_v7 }
 0xb4f   : > { %v2750_v43 = vrot.slane %v2749_v50, 1 }
 0xb50   : > { %v2756_v24 = vrot.slane %v2755_v12, 1 }
 0xb51   : > { %v2751_v25 = vmax.f32 %v2749_v50, %v2750_v43 }
 0xb52   : > { %v2757_v33 = vmax.f32 %v2755_v12, %v2756_v24 }
 0xb53   : > { %v2758_v34 = vsub.f32 %v2744_v42, %v2751_v25 }
 0xb54   : > { %v2759_v40 = vsub.f32 %v2745_v45, %v2757_v33 }
 0xb55   : > { %v2760_v41 = vmul.f32 1.442695, %v2758_v34 }
 0xb56   : > { %v2762_v51 = vmul.f32 1.442695, %v2759_v40 }
 0xb57   : > { %3557 = vpow2.f32 %v2760_v41 }
 0xb58   : > { %3559 = vpow2.f32 %v2762_v51 }
 0xb61   : > { %v3558_v61 = vpop.eup %3557 }
 0xb62   : > { %v3560_v57 = vpop.eup %3559  ;;  %v2764_v4 = vrot.slane %v3558_v61, 4 }
 0xb63   : > { %v2770_v26 = vrot.slane %v3560_v57, 4 }
 0xb64   : > { %v2765_v35 = vadd.f32 %v3558_v61, %v2764_v4 }
 0xb65   : > { %v2771_v60 = vadd.f32 %v3560_v57, %v2770_v26 }
 0xb66   : > { %v2766_v3 = vrot.slane %v2765_v35, 2 }
 0xb67   : > { %v2772_v9 = vrot.slane %v2771_v60, 2 }
 0xb68   : > { %v2767_v31 = vadd.f32 %v2766_v3, %v2765_v35 }
 0xb69   : > { %v2773_v10 = vadd.f32 %v2772_v9, %v2771_v60 }
 0xb6a   : > { %v2768_v6 = vrot.slane %v2767_v31, 1 }
 0xb6b   : > { %v2774_v44 = vrot.slane %v2773_v10, 1 }
 0xb6c   : > { %v2769_v27 = vadd.f32 %v2768_v6, %v2767_v31 }
 0xb6d   : > { %v2775_v48 = vadd.f32 %v2774_v44, %v2773_v10 }
 0xb6e   : > { %3561 = vrcp.f32 %v2769_v27 }
 0xb6f   : > { %3563 = vrcp.f32 %v2775_v48 }
 0xb78   : > { %v3562_v59 = vpop.eup %3561 }
 0xb79   : > { %v3564_v36 = vpop.eup %3563  ;;  %v2777_v13 = vmul.f32 %v3562_v59, %v3558_v61 }
 0xb7a   : > { %v2779_v53 = vmul.f32 %v3564_v36, %v3560_v57 }
 0xb7b   : > { %3013 = vst [vmem:[%s4242_s28 + $0x10] sm:$0xff] %v2777_v13 }
 0xb7c   : > { %3014 = vst [vmem:[%s4242_s28 + $0x18] sm:$0xff] %v2779_v53 }
 0xb7d PF: > { %s27_s20 = sadd.s32 1, %s3572_s20  }
 0xb7e   : > { %p24_p4 = scmp.ge.s32.totalorder %s27_s20, 4  }
 0xb80   :  { %26 = sbr.rel (!%p24_p4) target bundleno = 2 (0x2), region = 144 }

</bundles_post_ra>
